<compile_context>
chip_gen: v5e
topology: v5e:2x2
jax: 0.10.0
libtpu: 0.0.40
codegen_flags: <defaults>
</compile_context>

<pallas_src>
import functools
import math

import jax
import jax.numpy as jnp
from jax import lax
from jax.experimental import pallas as pl
from jax.experimental.pallas import tpu as pltpu


def _round_up(n, m):
    return ((n + m - 1) // m) * m


def _layernorm(v, g, b, eps=1e-5):
    mu = jnp.mean(v, axis=-1, keepdims=True)
    var = jnp.mean(jnp.square(v - mu), axis=-1, keepdims=True)
    return (v - mu) * lax.rsqrt(var + eps) * g + b


# ----------------------------------------------------------------------------
# Kernel
# ----------------------------------------------------------------------------
def actor_critic_kernel(x_ref, mats_ref, vecs_ref, out_ref, *,
                        input_size, hidden_size, seq_len, num_actions,
                        out_width):
    F = input_size
    H = hidden_size
    H2 = H // 2
    G = 4 * H
    S = seq_len
    A = num_actions
    B = x_ref.shape[0]

    # ---- unpack packed parameter slabs (static slices) ----
    r = 0
    w_ih = mats_ref[r:r + F, 0:G]; r += F          # (F, 4H), gate order [i,f,o,g]
    w_hh = mats_ref[r:r + H, 0:G]; r += H          # (H, 4H)
    sh_w = mats_ref[r:r + H, 0:H]; r += H          # (H, H)
    ac1_w = mats_ref[r:r + H, 0:H]; r += H         # (H, H)   [actor | critic]
    ac2_w = mats_ref[r:r + H, 0:out_width]         # (H, Wout) block-diag heads

    in_ln_g = vecs_ref[0:1, 0:F]
    in_ln_b = vecs_ref[1:2, 0:F]
    b_lstm = vecs_ref[2:3, 0:G]
    sh_b = vecs_ref[3:4, 0:H]
    sh_ln_g = vecs_ref[4:5, 0:H]
    sh_ln_b = vecs_ref[5:6, 0:H]
    ac1_b = vecs_ref[6:7, 0:H]
    a_ln_g = vecs_ref[7:8, 0:H2]
    a_ln_b = vecs_ref[8:9, 0:H2]
    c_ln_g = vecs_ref[9:10, 0:H2]
    c_ln_b = vecs_ref[10:11, 0:H2]
    ac2_b = vecs_ref[11:12, 0:out_width]

    # ---- input LayerNorm over feature dim ----
    x = x_ref[...].astype(jnp.float32)
    x = _layernorm(x, in_ln_g, in_ln_b)

    # ---- hoisted LSTM input projection: ONE matmul over all timesteps ----
    xg = jnp.dot(x.reshape(B * S, F), w_ih,
                 preferred_element_type=jnp.float32) + b_lstm
    xg = xg.reshape(B, S, G)

    # ---- 1-layer LSTM recurrence; only h @ w_hh remains on the serial chain.
    # Gates packed as [i, f, o, g]: sigmoid on one contiguous 3H slice,
    # tanh on the 1H tail.
    h = jnp.zeros((B, H), jnp.float32)
    c = jnp.zeros((B, H), jnp.float32)
    for t in range(S):  # static unroll; S is a small compile-time constant
        gates = xg[:, t, :] + jnp.dot(h, w_hh,
                                      preferred_element_type=jnp.float32)
        sig = jax.nn.sigmoid(gates[:, 0:3 * H])
        g_g = jnp.tanh(gates[:, 3 * H:4 * H])
        i_g = sig[:, 0:H]
        f_g = sig[:, H:2 * H]
        o_g = sig[:, 2 * H:3 * H]
        c = f_g * c + i_g * g_g
        h = o_g * jnp.tanh(c)
    # TODO(synk): for long sequences switch this static unroll to a
    # lax.fori_loop over a VMEM scratch holding xg to bound register pressure.

    # ---- shared: Linear -> ReLU -> LayerNorm (Dropout = identity, eval) ----
    sh = jnp.dot(h, sh_w, preferred_element_type=jnp.float32) + sh_b
    sh = _layernorm(jnp.maximum(sh, 0.0), sh_ln_g, sh_ln_b)

    # ---- fused actor/critic hidden layer (single matmul), per-branch LN ----
    ac = jnp.dot(sh, ac1_w, preferred_element_type=jnp.float32) + ac1_b
    ac = jnp.maximum(ac, 0.0)
    ah = _layernorm(ac[:, 0:H2], a_ln_g, a_ln_b)
    ch = _layernorm(ac[:, H2:H], c_ln_g, c_ln_b)
    ahch = jnp.concatenate([ah, ch], axis=-1)          # (B, H)

    # ---- fused output heads (block-diag weights) -> lane-dense output ----
    y = jnp.dot(ahch, ac2_w, preferred_element_type=jnp.float32) + ac2_b
    lane = lax.broadcasted_iota(jnp.int32, y.shape, 1)
    logits = jnp.where(lane < A, y, jnp.float32(-1e30))
    m = jnp.max(logits, axis=-1, keepdims=True)
    e = jnp.exp(logits - m)                            # padded lanes -> 0
    probs = e * pl.reciprocal(jnp.sum(e, axis=-1, keepdims=True))
    # columns [0, A) = softmax probs, column A = critic value, rest = 0
    out_ref[...] = jnp.where(lane == A, y, probs)
    # TODO(synk): training-mode Dropout(0.1) not implemented (eval semantics).


# ----------------------------------------------------------------------------
# Wrapper
# ----------------------------------------------------------------------------
def actor_critic_forward(x, packed, *, hidden_size, num_actions=5,
                         batch_tile=None):
    B, S, Fdim = x.shape
    mats, vecs = packed["mats"], packed["vecs"]
    Wout = _round_up(num_actions + 1, 128)

    tile_b = batch_tile if batch_tile is not None else B
    assert B % tile_b == 0
    assert tile_b == B or tile_b % 8 == 0, "batch tile must be a sublane multiple"
    grid = (B // tile_b,)

    kernel = functools.partial(
        actor_critic_kernel, input_size=Fdim, hidden_size=hidden_size,
        seq_len=S, num_actions=num_actions, out_width=Wout)

    out = pl.pallas_call(
        kernel,
        out_shape=jax.ShapeDtypeStruct((B, Wout), jnp.float32),
        grid=grid,
        in_specs=[
            pl.BlockSpec((tile_b, S, Fdim), lambda i: (i, 0, 0)),
            pl.BlockSpec(mats.shape, lambda i: (0, 0)),
            pl.BlockSpec(vecs.shape, lambda i: (0, 0)),
        ],
        out_specs=pl.BlockSpec((tile_b, Wout), lambda i: (i, 0)),
        compiler_params=pltpu.CompilerParams(
            dimension_semantics=("parallel",)),
    )(x, mats, vecs)

    probs = out[:, 0:num_actions]
    value = out[:, num_actions:num_actions + 1]
    return probs, value


# ----------------------------------------------------------------------------
# Parameters (PyTorch layout) and packing into kernel slabs
# ----------------------------------------------------------------------------
def init_params(key, input_size, hidden_size, num_actions=5):
    H, H2 = hidden_size, hidden_size // 2
    ks = jax.random.split(key, 9)
    ortho = jax.nn.initializers.orthogonal(scale=math.sqrt(2.0))
    k_lstm = 1.0 / math.sqrt(H)

    def uni(k, shape):
        return jax.random.uniform(k, shape, jnp.float32, -k_lstm, k_lstm)

    p = {}
    p["in_ln_g"] = jnp.ones((input_size,), jnp.float32)
    p["in_ln_b"] = jnp.zeros((input_size,), jnp.float32)
    # LSTM (PyTorch layout: (4H, in), gate blocks [i, f, g, o])
    p["w_ih"] = uni(ks[0], (4 * H, input_size))
    p["w_hh"] = uni(ks[1], (4 * H, H))
    p["b_ih"] = uni(ks[2], (4 * H,))
    p["b_hh"] = uni(ks[3], (4 * H,))
    # shared
    p["sh_w"] = ortho(ks[4], (H, H), jnp.float32)
    p["sh_b"] = jnp.zeros((H,), jnp.float32)
    p["sh_ln_g"] = jnp.ones((H,), jnp.float32)
    p["sh_ln_b"] = jnp.zeros((H,), jnp.float32)
    # actor
    p["a1_w"] = ortho(ks[5], (H2, H), jnp.float32)
    p["a1_b"] = jnp.zeros((H2,), jnp.float32)
    p["a_ln_g"] = jnp.ones((H2,), jnp.float32)
    p["a_ln_b"] = jnp.zeros((H2,), jnp.float32)
    p["a2_w"] = ortho(ks[6], (num_actions, H2), jnp.float32)
    p["a2_b"] = jnp.zeros((num_actions,), jnp.float32)
    # critic
    p["c1_w"] = ortho(ks[7], (H2, H), jnp.float32)
    p["c1_b"] = jnp.zeros((H2,), jnp.float32)
    p["c_ln_g"] = jnp.ones((H2,), jnp.float32)
    p["c_ln_b"] = jnp.zeros((H2,), jnp.float32)
    p["c2_w"] = ortho(ks[8], (1, H2), jnp.float32)
    p["c2_b"] = jnp.zeros((1,), jnp.float32)
    return p


def pack_params(p, input_size, hidden_size, num_actions=5):
    """Pack all parameters into two contiguous f32 slabs (mats, vecs)."""
    F, H = input_size, hidden_size
    H2, G = H // 2, 4 * H
    Wout = _round_up(num_actions + 1, 128)
    Wpad = _round_up(max(G, F, H, Wout), 128)

    def row(v):
        v = jnp.asarray(v, jnp.float32).reshape(1, -1)
        return jnp.pad(v, ((0, 0), (0, Wpad - v.shape[1])))

    def mat(w):
        w = jnp.asarray(w, jnp.float32)
        return jnp.pad(w, ((0, 0), (0, Wpad - w.shape[1])))

    def reorder_gates(w_t):   # (in, 4H), PyTorch [i,f,g,o] -> kernel [i,f,o,g]
        i, f, g, o = (w_t[:, 0:H], w_t[:, H:2 * H],
                      w_t[:, 2 * H:3 * H], w_t[:, 3 * H:4 * H])
        return jnp.concatenate([i, f, o, g], axis=1)

    w_ih = reorder_gates(p["w_ih"].T)                         # (F, 4H)
    w_hh = reorder_gates(p["w_hh"].T)                         # (H, 4H)
    b_lstm = reorder_gates((p["b_ih"] + p["b_hh"]).reshape(1, G))

    sh_w = p["sh_w"].T                                        # (H, H)
    ac1_w = jnp.concatenate([p["a1_w"].T, p["c1_w"].T], axis=1)   # (H, H)
    ac1_b = jnp.concatenate([p["a1_b"], p["c1_b"]])               # (H,)

    # block-diagonal fused head: [ah | ch] @ W2 + b2 -> [logits | value | 0...]
    ac2_w = jnp.zeros((H, Wout), jnp.float32)
    ac2_w = ac2_w.at[0:H2, 0:num_actions].set(p["a2_w"].T)
    ac2_w = ac2_w.at[H2:H, num_actions:num_actions + 1].set(p["c2_w"].T)
    ac2_b = jnp.zeros((1, Wout), jnp.float32)
    ac2_b = ac2_b.at[0, 0:num_actions].set(p["a2_b"])
    ac2_b = ac2_b.at[0, num_actions].set(p["c2_b"][0])

    mats = jnp.concatenate(
        [mat(w_ih), mat(w_hh), mat(sh_w), mat(ac1_w), mat(ac2_w)], axis=0)
    vecs = jnp.concatenate(
        [row(p["in_ln_g"]), row(p["in_ln_b"]), row(b_lstm),
         row(p["sh_b"]), row(p["sh_ln_g"]), row(p["sh_ln_b"]),
         row(ac1_b),
         row(p["a_ln_g"]), row(p["a_ln_b"]), row(p["c_ln_g"]), row(p["c_ln_b"]),
         row(ac2_b)], axis=0)
    return {"mats": mats, "vecs": vecs}


# ----------------------------------------------------------------------------
# Pure-JAX reference (PyTorch eval semantics) for correctness checking
# ----------------------------------------------------------------------------
def reference_forward(x, p, hidden_size):
    H = hidden_size
    hp = jax.lax.Precision.HIGHEST

    def dot(a, b):
        return jnp.dot(a, b, precision=hp)

    def ln(v, g, b, eps=1e-5):
        mu = v.mean(-1, keepdims=True)
        var = ((v - mu) ** 2).mean(-1, keepdims=True)
        return (v - mu) / jnp.sqrt(var + eps) * g + b

    x = ln(x, p["in_ln_g"], p["in_ln_b"])
    B, S, _ = x.shape
    h = jnp.zeros((B, H), jnp.float32)
    c = jnp.zeros((B, H), jnp.float32)
    for t in range(S):
        gates = (dot(x[:, t, :], p["w_ih"].T) + p["b_ih"]
                 + dot(h, p["w_hh"].T) + p["b_hh"])
        i = jax.nn.sigmoid(gates[:, 0:H])
        f = jax.nn.sigmoid(gates[:, H:2 * H])
        g = jnp.tanh(gates[:, 2 * H:3 * H])
        o = jax.nn.sigmoid(gates[:, 3 * H:4 * H])
        c = f * c + i * g
        h = o * jnp.tanh(c)
    sh = ln(jnp.maximum(dot(h, p["sh_w"].T) + p["sh_b"], 0.0),
            p["sh_ln_g"], p["sh_ln_b"])
    ah = ln(jnp.maximum(dot(sh, p["a1_w"].T) + p["a1_b"], 0.0),
            p["a_ln_g"], p["a_ln_b"])
    probs = jax.nn.softmax(dot(ah, p["a2_w"].T) + p["a2_b"], axis=-1)
    ch = ln(jnp.maximum(dot(sh, p["c1_w"].T) + p["c1_b"], 0.0),
            p["c_ln_g"], p["c_ln_b"])
    value = dot(ch, p["c2_w"].T) + p["c2_b"]
    return probs, value


if __name__ == "__main__":
    B, S, F, H = 2, 8, 16, 32  # batch, seq, input_size, hidden_size
    key = jax.random.PRNGKey(0)
    kx, kp = jax.random.split(key)
    x = jax.random.normal(kx, (B, S, F), jnp.float32)

    params = init_params(kp, F, H)
    packed = pack_params(params, F, H)

    probs, value = actor_critic_forward(x, packed, hidden_size=H)
    jax.block_until_ready((probs, value))

    assert probs.shape == (B, 5) and value.shape == (B, 1)
    assert bool(jnp.all(jnp.isfinite(probs))) and bool(jnp.all(jnp.isfinite(value)))
    assert bool(jnp.allclose(jnp.sum(probs, axis=-1), 1.0, atol=1e-5))

    ref_probs, ref_value = reference_forward(x, params, H)
    assert bool(jnp.allclose(probs, ref_probs, atol=1e-3, rtol=1e-3))
    assert bool(jnp.allclose(value, ref_value, atol=1e-3, rtol=1e-3))

    print("KERNEL_OK")
</pallas_src>

<mosaic_0001>
module attributes {stable_mosaic.version = 11 : i64} {
  func.func @actor_critic_kernel(%arg0: i32, %arg1: memref<2x8x16xf32, #tpu.memory_space<vmem>>, %arg2: memref<144x128xf32, #tpu.memory_space<vmem>>, %arg3: memref<12x128xf32, #tpu.memory_space<vmem>>, %arg4: memref<2x128xf32, #tpu.memory_space<vmem>>) attributes {dimension_semantics = [#tpu.dimension_semantics<parallel>], iteration_bounds = array<i64: 1>, scalar_prefetch = 0 : i64, scratch_operands = 0 : i64, tpu.core_type = #tpu.core_type<tc>, window_params = [{transform_indices = @transform_0, window_bounds = array<i64: 2, 8, 16>}, {pipeline_mode = #tpu.pipeline_mode<synchronous>, transform_indices = @transform_1, window_bounds = array<i64: 144, 128>}, {pipeline_mode = #tpu.pipeline_mode<synchronous>, transform_indices = @transform_2, window_bounds = array<i64: 12, 128>}, {transform_indices = @transform_3, window_bounds = array<i64: 2, 128>}]} {
    %c0 = arith.constant 0 : index
    %c0_0 = arith.constant 0 : index
    %0 = vector.load %arg2[%c0, %c0_0] : memref<144x128xf32, #tpu.memory_space<vmem>>, vector<16x128xf32>
    %c16 = arith.constant 16 : index
    %c0_1 = arith.constant 0 : index
    %1 = vector.load %arg2[%c16, %c0_1] : memref<144x128xf32, #tpu.memory_space<vmem>>, vector<32x128xf32>
    %c48 = arith.constant 48 : index
    %c0_2 = arith.constant 0 : index
    %2 = vector.load %arg2[%c48, %c0_2] : memref<144x128xf32, #tpu.memory_space<vmem>>, vector<32x32xf32>
    %c80 = arith.constant 80 : index
    %c0_3 = arith.constant 0 : index
    %3 = vector.load %arg2[%c80, %c0_3] : memref<144x128xf32, #tpu.memory_space<vmem>>, vector<32x32xf32>
    %c112 = arith.constant 112 : index
    %c0_4 = arith.constant 0 : index
    %4 = vector.load %arg2[%c112, %c0_4] : memref<144x128xf32, #tpu.memory_space<vmem>>, vector<32x128xf32>
    %c0_5 = arith.constant 0 : index
    %c0_6 = arith.constant 0 : index
    %5 = vector.load %arg3[%c0_5, %c0_6] : memref<12x128xf32, #tpu.memory_space<vmem>>, vector<1x16xf32>
    %c1 = arith.constant 1 : index
    %c0_7 = arith.constant 0 : index
    %6 = vector.load %arg3[%c1, %c0_7] : memref<12x128xf32, #tpu.memory_space<vmem>>, vector<1x16xf32>
    %c2 = arith.constant 2 : index
    %c0_8 = arith.constant 0 : index
    %7 = vector.load %arg3[%c2, %c0_8] : memref<12x128xf32, #tpu.memory_space<vmem>>, vector<1x128xf32>
    %c3 = arith.constant 3 : index
    %c0_9 = arith.constant 0 : index
    %8 = vector.load %arg3[%c3, %c0_9] : memref<12x128xf32, #tpu.memory_space<vmem>>, vector<1x32xf32>
    %c4 = arith.constant 4 : index
    %c0_10 = arith.constant 0 : index
    %9 = vector.load %arg3[%c4, %c0_10] : memref<12x128xf32, #tpu.memory_space<vmem>>, vector<1x32xf32>
    %c5 = arith.constant 5 : index
    %c0_11 = arith.constant 0 : index
    %10 = vector.load %arg3[%c5, %c0_11] : memref<12x128xf32, #tpu.memory_space<vmem>>, vector<1x32xf32>
    %c6 = arith.constant 6 : index
    %c0_12 = arith.constant 0 : index
    %11 = vector.load %arg3[%c6, %c0_12] : memref<12x128xf32, #tpu.memory_space<vmem>>, vector<1x32xf32>
    %c7 = arith.constant 7 : index
    %c0_13 = arith.constant 0 : index
    %12 = vector.load %arg3[%c7, %c0_13] : memref<12x128xf32, #tpu.memory_space<vmem>>, vector<1x16xf32>
    %c8 = arith.constant 8 : index
    %c0_14 = arith.constant 0 : index
    %13 = vector.load %arg3[%c8, %c0_14] : memref<12x128xf32, #tpu.memory_space<vmem>>, vector<1x16xf32>
    %c9 = arith.constant 9 : index
    %c0_15 = arith.constant 0 : index
    %14 = vector.load %arg3[%c9, %c0_15] : memref<12x128xf32, #tpu.memory_space<vmem>>, vector<1x16xf32>
    %c10 = arith.constant 10 : index
    %c0_16 = arith.constant 0 : index
    %15 = vector.load %arg3[%c10, %c0_16] : memref<12x128xf32, #tpu.memory_space<vmem>>, vector<1x16xf32>
    %c11 = arith.constant 11 : index
    %c0_17 = arith.constant 0 : index
    %16 = vector.load %arg3[%c11, %c0_17] : memref<12x128xf32, #tpu.memory_space<vmem>>, vector<1x128xf32>
    %c0_18 = arith.constant 0 : index
    %c0_19 = arith.constant 0 : index
    %c0_20 = arith.constant 0 : index
    %17 = vector.load %arg1[%c0_18, %c0_19, %c0_20] : memref<2x8x16xf32, #tpu.memory_space<vmem>>, vector<2x8x16xf32>
    %cst = arith.constant dense<0.000000e+00> : vector<2x8xf32>
    %18 = vector.multi_reduction <add>, %17, %cst [2] : vector<2x8x16xf32> to vector<2x8xf32>
    %19 = vector.shape_cast %18 : vector<2x8xf32> to vector<2x8x1xf32>
    %cst_21 = arith.constant 1.600000e+01 : f32
    %20 = vector.broadcast %cst_21 : f32 to vector<2x8x1xf32>
    %21 = arith.divf %19, %20 : vector<2x8x1xf32>
    %22 = vector.broadcast %21 : vector<2x8x1xf32> to vector<2x8x16xf32>
    %23 = arith.subf %17, %22 : vector<2x8x16xf32>
    %24 = arith.mulf %23, %23 : vector<2x8x16xf32>
    %cst_22 = arith.constant dense<0.000000e+00> : vector<2x8xf32>
    %25 = vector.multi_reduction <add>, %24, %cst_22 [2] : vector<2x8x16xf32> to vector<2x8xf32>
    %26 = vector.shape_cast %25 : vector<2x8xf32> to vector<2x8x1xf32>
    %cst_23 = arith.constant 1.600000e+01 : f32
    %27 = vector.broadcast %cst_23 : f32 to vector<2x8x1xf32>
    %28 = arith.divf %26, %27 : vector<2x8x1xf32>
    %29 = vector.broadcast %21 : vector<2x8x1xf32> to vector<2x8x16xf32>
    %30 = arith.subf %17, %29 : vector<2x8x16xf32>
    %cst_24 = arith.constant 9.99999974E-6 : f32
    %31 = vector.broadcast %cst_24 : f32 to vector<2x8x1xf32>
    %32 = arith.addf %28, %31 : vector<2x8x1xf32>
    %33 = math.rsqrt %32 : vector<2x8x1xf32>
    %34 = vector.broadcast %33 : vector<2x8x1xf32> to vector<2x8x16xf32>
    %35 = arith.mulf %30, %34 : vector<2x8x16xf32>
    %36 = vector.shape_cast %5 : vector<1x16xf32> to vector<1x1x16xf32>
    %37 = vector.broadcast %36 : vector<1x1x16xf32> to vector<2x8x16xf32>
    %38 = arith.mulf %35, %37 : vector<2x8x16xf32>
    %39 = vector.shape_cast %6 : vector<1x16xf32> to vector<1x1x16xf32>
    %40 = vector.broadcast %39 : vector<1x1x16xf32> to vector<2x8x16xf32>
    %41 = arith.addf %38, %40 : vector<2x8x16xf32>
    %42 = vector.shape_cast %41 : vector<2x8x16xf32> to vector<16x16xf32>
    %cst_25 = arith.constant dense<0.000000e+00> : vector<16x128xf32>
    %43 = tpu.matmul %42, %0, %cst_25 {dimension_numbers = #tpu.dot_dimension_numbers<[1], [0], [0], [1], [0, 0, 1, 1], [], []>} : vector<16x16xf32>, vector<16x128xf32>, vector<16x128xf32> -> vector<16x128xf32>
    %44 = vector.broadcast %7 : vector<1x128xf32> to vector<16x128xf32>
    %45 = arith.addf %43, %44 : vector<16x128xf32>
    %46 = vector.shape_cast %45 : vector<16x128xf32> to vector<2x8x128xf32>
    %cst_26 = arith.constant 0.000000e+00 : f32
    %47 = vector.broadcast %cst_26 : f32 to vector<2x32xf32>
    %cst_27 = arith.constant 0.000000e+00 : f32
    %48 = vector.broadcast %cst_27 : f32 to vector<2x32xf32>
    %49 = vector.extract_strided_slice %46 {offsets = [0, 0, 0], sizes = [2, 1, 128], strides = [1, 1, 1]} : vector<2x8x128xf32> to vector<2x1x128xf32>
    %50 = vector.shape_cast %49 : vector<2x1x128xf32> to vector<2x128xf32>
    %cst_28 = arith.constant dense<0.000000e+00> : vector<2x128xf32>
    %51 = tpu.matmul %47, %1, %cst_28 {dimension_numbers = #tpu.dot_dimension_numbers<[1], [0], [0], [1], [0, 0, 1, 1], [], []>} : vector<2x32xf32>, vector<32x128xf32>, vector<2x128xf32> -> vector<2x128xf32>
    %52 = arith.addf %50, %51 : vector<2x128xf32>
    %53 = vector.extract_strided_slice %52 {offsets = [0, 0], sizes = [2, 96], strides = [1, 1]} : vector<2x128xf32> to vector<2x96xf32>
    %54 = arith.negf %53 : vector<2x96xf32>
    %55 = math.exp %54 : vector<2x96xf32>
    %cst_29 = arith.constant 1.000000e+00 : f32
    %56 = vector.broadcast %cst_29 : f32 to vector<2x96xf32>
    %57 = arith.addf %56, %55 : vector<2x96xf32>
    %58 = arith.divf %56, %57 : vector<2x96xf32>
    %59 = vector.extract_strided_slice %52 {offsets = [0, 96], sizes = [2, 32], strides = [1, 1]} : vector<2x128xf32> to vector<2x32xf32>
    %60 = math.tanh %59 : vector<2x32xf32>
    %61 = vector.extract_strided_slice %58 {offsets = [0, 0], sizes = [2, 32], strides = [1, 1]} : vector<2x96xf32> to vector<2x32xf32>
    %62 = vector.extract_strided_slice %58 {offsets = [0, 32], sizes = [2, 32], strides = [1, 1]} : vector<2x96xf32> to vector<2x32xf32>
    %63 = vector.extract_strided_slice %58 {offsets = [0, 64], sizes = [2, 32], strides = [1, 1]} : vector<2x96xf32> to vector<2x32xf32>
    %64 = arith.mulf %62, %48 : vector<2x32xf32>
    %65 = arith.mulf %61, %60 : vector<2x32xf32>
    %66 = arith.addf %64, %65 : vector<2x32xf32>
    %67 = math.tanh %66 : vector<2x32xf32>
    %68 = arith.mulf %63, %67 : vector<2x32xf32>
    %69 = vector.extract_strided_slice %46 {offsets = [0, 1, 0], sizes = [2, 1, 128], strides = [1, 1, 1]} : vector<2x8x128xf32> to vector<2x1x128xf32>
    %70 = vector.shape_cast %69 : vector<2x1x128xf32> to vector<2x128xf32>
    %cst_30 = arith.constant dense<0.000000e+00> : vector<2x128xf32>
    %71 = tpu.matmul %68, %1, %cst_30 {dimension_numbers = #tpu.dot_dimension_numbers<[1], [0], [0], [1], [0, 0, 1, 1], [], []>} : vector<2x32xf32>, vector<32x128xf32>, vector<2x128xf32> -> vector<2x128xf32>
    %72 = arith.addf %70, %71 : vector<2x128xf32>
    %73 = vector.extract_strided_slice %72 {offsets = [0, 0], sizes = [2, 96], strides = [1, 1]} : vector<2x128xf32> to vector<2x96xf32>
    %74 = arith.negf %73 : vector<2x96xf32>
    %75 = math.exp %74 : vector<2x96xf32>
    %cst_31 = arith.constant 1.000000e+00 : f32
    %76 = vector.broadcast %cst_31 : f32 to vector<2x96xf32>
    %77 = arith.addf %76, %75 : vector<2x96xf32>
    %78 = arith.divf %76, %77 : vector<2x96xf32>
    %79 = vector.extract_strided_slice %72 {offsets = [0, 96], sizes = [2, 32], strides = [1, 1]} : vector<2x128xf32> to vector<2x32xf32>
    %80 = math.tanh %79 : vector<2x32xf32>
    %81 = vector.extract_strided_slice %78 {offsets = [0, 0], sizes = [2, 32], strides = [1, 1]} : vector<2x96xf32> to vector<2x32xf32>
    %82 = vector.extract_strided_slice %78 {offsets = [0, 32], sizes = [2, 32], strides = [1, 1]} : vector<2x96xf32> to vector<2x32xf32>
    %83 = vector.extract_strided_slice %78 {offsets = [0, 64], sizes = [2, 32], strides = [1, 1]} : vector<2x96xf32> to vector<2x32xf32>
    %84 = arith.mulf %82, %66 : vector<2x32xf32>
    %85 = arith.mulf %81, %80 : vector<2x32xf32>
    %86 = arith.addf %84, %85 : vector<2x32xf32>
    %87 = math.tanh %86 : vector<2x32xf32>
    %88 = arith.mulf %83, %87 : vector<2x32xf32>
    %89 = vector.extract_strided_slice %46 {offsets = [0, 2, 0], sizes = [2, 1, 128], strides = [1, 1, 1]} : vector<2x8x128xf32> to vector<2x1x128xf32>
    %90 = vector.shape_cast %89 : vector<2x1x128xf32> to vector<2x128xf32>
    %cst_32 = arith.constant dense<0.000000e+00> : vector<2x128xf32>
    %91 = tpu.matmul %88, %1, %cst_32 {dimension_numbers = #tpu.dot_dimension_numbers<[1], [0], [0], [1], [0, 0, 1, 1], [], []>} : vector<2x32xf32>, vector<32x128xf32>, vector<2x128xf32> -> vector<2x128xf32>
    %92 = arith.addf %90, %91 : vector<2x128xf32>
    %93 = vector.extract_strided_slice %92 {offsets = [0, 0], sizes = [2, 96], strides = [1, 1]} : vector<2x128xf32> to vector<2x96xf32>
    %94 = arith.negf %93 : vector<2x96xf32>
    %95 = math.exp %94 : vector<2x96xf32>
    %cst_33 = arith.constant 1.000000e+00 : f32
    %96 = vector.broadcast %cst_33 : f32 to vector<2x96xf32>
    %97 = arith.addf %96, %95 : vector<2x96xf32>
    %98 = arith.divf %96, %97 : vector<2x96xf32>
    %99 = vector.extract_strided_slice %92 {offsets = [0, 96], sizes = [2, 32], strides = [1, 1]} : vector<2x128xf32> to vector<2x32xf32>
    %100 = math.tanh %99 : vector<2x32xf32>
    %101 = vector.extract_strided_slice %98 {offsets = [0, 0], sizes = [2, 32], strides = [1, 1]} : vector<2x96xf32> to vector<2x32xf32>
    %102 = vector.extract_strided_slice %98 {offsets = [0, 32], sizes = [2, 32], strides = [1, 1]} : vector<2x96xf32> to vector<2x32xf32>
    %103 = vector.extract_strided_slice %98 {offsets = [0, 64], sizes = [2, 32], strides = [1, 1]} : vector<2x96xf32> to vector<2x32xf32>
    %104 = arith.mulf %102, %86 : vector<2x32xf32>
    %105 = arith.mulf %101, %100 : vector<2x32xf32>
    %106 = arith.addf %104, %105 : vector<2x32xf32>
    %107 = math.tanh %106 : vector<2x32xf32>
    %108 = arith.mulf %103, %107 : vector<2x32xf32>
    %109 = vector.extract_strided_slice %46 {offsets = [0, 3, 0], sizes = [2, 1, 128], strides = [1, 1, 1]} : vector<2x8x128xf32> to vector<2x1x128xf32>
    %110 = vector.shape_cast %109 : vector<2x1x128xf32> to vector<2x128xf32>
    %cst_34 = arith.constant dense<0.000000e+00> : vector<2x128xf32>
    %111 = tpu.matmul %108, %1, %cst_34 {dimension_numbers = #tpu.dot_dimension_numbers<[1], [0], [0], [1], [0, 0, 1, 1], [], []>} : vector<2x32xf32>, vector<32x128xf32>, vector<2x128xf32> -> vector<2x128xf32>
    %112 = arith.addf %110, %111 : vector<2x128xf32>
    %113 = vector.extract_strided_slice %112 {offsets = [0, 0], sizes = [2, 96], strides = [1, 1]} : vector<2x128xf32> to vector<2x96xf32>
    %114 = arith.negf %113 : vector<2x96xf32>
    %115 = math.exp %114 : vector<2x96xf32>
    %cst_35 = arith.constant 1.000000e+00 : f32
    %116 = vector.broadcast %cst_35 : f32 to vector<2x96xf32>
    %117 = arith.addf %116, %115 : vector<2x96xf32>
    %118 = arith.divf %116, %117 : vector<2x96xf32>
    %119 = vector.extract_strided_slice %112 {offsets = [0, 96], sizes = [2, 32], strides = [1, 1]} : vector<2x128xf32> to vector<2x32xf32>
    %120 = math.tanh %119 : vector<2x32xf32>
    %121 = vector.extract_strided_slice %118 {offsets = [0, 0], sizes = [2, 32], strides = [1, 1]} : vector<2x96xf32> to vector<2x32xf32>
    %122 = vector.extract_strided_slice %118 {offsets = [0, 32], sizes = [2, 32], strides = [1, 1]} : vector<2x96xf32> to vector<2x32xf32>
    %123 = vector.extract_strided_slice %118 {offsets = [0, 64], sizes = [2, 32], strides = [1, 1]} : vector<2x96xf32> to vector<2x32xf32>
    %124 = arith.mulf %122, %106 : vector<2x32xf32>
    %125 = arith.mulf %121, %120 : vector<2x32xf32>
    %126 = arith.addf %124, %125 : vector<2x32xf32>
    %127 = math.tanh %126 : vector<2x32xf32>
    %128 = arith.mulf %123, %127 : vector<2x32xf32>
    %129 = vector.extract_strided_slice %46 {offsets = [0, 4, 0], sizes = [2, 1, 128], strides = [1, 1, 1]} : vector<2x8x128xf32> to vector<2x1x128xf32>
    %130 = vector.shape_cast %129 : vector<2x1x128xf32> to vector<2x128xf32>
    %cst_36 = arith.constant dense<0.000000e+00> : vector<2x128xf32>
    %131 = tpu.matmul %128, %1, %cst_36 {dimension_numbers = #tpu.dot_dimension_numbers<[1], [0], [0], [1], [0, 0, 1, 1], [], []>} : vector<2x32xf32>, vector<32x128xf32>, vector<2x128xf32> -> vector<2x128xf32>
    %132 = arith.addf %130, %131 : vector<2x128xf32>
    %133 = vector.extract_strided_slice %132 {offsets = [0, 0], sizes = [2, 96], strides = [1, 1]} : vector<2x128xf32> to vector<2x96xf32>
    %134 = arith.negf %133 : vector<2x96xf32>
    %135 = math.exp %134 : vector<2x96xf32>
    %cst_37 = arith.constant 1.000000e+00 : f32
    %136 = vector.broadcast %cst_37 : f32 to vector<2x96xf32>
    %137 = arith.addf %136, %135 : vector<2x96xf32>
    %138 = arith.divf %136, %137 : vector<2x96xf32>
    %139 = vector.extract_strided_slice %132 {offsets = [0, 96], sizes = [2, 32], strides = [1, 1]} : vector<2x128xf32> to vector<2x32xf32>
    %140 = math.tanh %139 : vector<2x32xf32>
    %141 = vector.extract_strided_slice %138 {offsets = [0, 0], sizes = [2, 32], strides = [1, 1]} : vector<2x96xf32> to vector<2x32xf32>
    %142 = vector.extract_strided_slice %138 {offsets = [0, 32], sizes = [2, 32], strides = [1, 1]} : vector<2x96xf32> to vector<2x32xf32>
    %143 = vector.extract_strided_slice %138 {offsets = [0, 64], sizes = [2, 32], strides = [1, 1]} : vector<2x96xf32> to vector<2x32xf32>
    %144 = arith.mulf %142, %126 : vector<2x32xf32>
    %145 = arith.mulf %141, %140 : vector<2x32xf32>
    %146 = arith.addf %144, %145 : vector<2x32xf32>
    %147 = math.tanh %146 : vector<2x32xf32>
    %148 = arith.mulf %143, %147 : vector<2x32xf32>
    %149 = vector.extract_strided_slice %46 {offsets = [0, 5, 0], sizes = [2, 1, 128], strides = [1, 1, 1]} : vector<2x8x128xf32> to vector<2x1x128xf32>
    %150 = vector.shape_cast %149 : vector<2x1x128xf32> to vector<2x128xf32>
    %cst_38 = arith.constant dense<0.000000e+00> : vector<2x128xf32>
    %151 = tpu.matmul %148, %1, %cst_38 {dimension_numbers = #tpu.dot_dimension_numbers<[1], [0], [0], [1], [0, 0, 1, 1], [], []>} : vector<2x32xf32>, vector<32x128xf32>, vector<2x128xf32> -> vector<2x128xf32>
    %152 = arith.addf %150, %151 : vector<2x128xf32>
    %153 = vector.extract_strided_slice %152 {offsets = [0, 0], sizes = [2, 96], strides = [1, 1]} : vector<2x128xf32> to vector<2x96xf32>
    %154 = arith.negf %153 : vector<2x96xf32>
    %155 = math.exp %154 : vector<2x96xf32>
    %cst_39 = arith.constant 1.000000e+00 : f32
    %156 = vector.broadcast %cst_39 : f32 to vector<2x96xf32>
    %157 = arith.addf %156, %155 : vector<2x96xf32>
    %158 = arith.divf %156, %157 : vector<2x96xf32>
    %159 = vector.extract_strided_slice %152 {offsets = [0, 96], sizes = [2, 32], strides = [1, 1]} : vector<2x128xf32> to vector<2x32xf32>
    %160 = math.tanh %159 : vector<2x32xf32>
    %161 = vector.extract_strided_slice %158 {offsets = [0, 0], sizes = [2, 32], strides = [1, 1]} : vector<2x96xf32> to vector<2x32xf32>
    %162 = vector.extract_strided_slice %158 {offsets = [0, 32], sizes = [2, 32], strides = [1, 1]} : vector<2x96xf32> to vector<2x32xf32>
    %163 = vector.extract_strided_slice %158 {offsets = [0, 64], sizes = [2, 32], strides = [1, 1]} : vector<2x96xf32> to vector<2x32xf32>
    %164 = arith.mulf %162, %146 : vector<2x32xf32>
    %165 = arith.mulf %161, %160 : vector<2x32xf32>
    %166 = arith.addf %164, %165 : vector<2x32xf32>
    %167 = math.tanh %166 : vector<2x32xf32>
    %168 = arith.mulf %163, %167 : vector<2x32xf32>
    %169 = vector.extract_strided_slice %46 {offsets = [0, 6, 0], sizes = [2, 1, 128], strides = [1, 1, 1]} : vector<2x8x128xf32> to vector<2x1x128xf32>
    %170 = vector.shape_cast %169 : vector<2x1x128xf32> to vector<2x128xf32>
    %cst_40 = arith.constant dense<0.000000e+00> : vector<2x128xf32>
    %171 = tpu.matmul %168, %1, %cst_40 {dimension_numbers = #tpu.dot_dimension_numbers<[1], [0], [0], [1], [0, 0, 1, 1], [], []>} : vector<2x32xf32>, vector<32x128xf32>, vector<2x128xf32> -> vector<2x128xf32>
    %172 = arith.addf %170, %171 : vector<2x128xf32>
    %173 = vector.extract_strided_slice %172 {offsets = [0, 0], sizes = [2, 96], strides = [1, 1]} : vector<2x128xf32> to vector<2x96xf32>
    %174 = arith.negf %173 : vector<2x96xf32>
    %175 = math.exp %174 : vector<2x96xf32>
    %cst_41 = arith.constant 1.000000e+00 : f32
    %176 = vector.broadcast %cst_41 : f32 to vector<2x96xf32>
    %177 = arith.addf %176, %175 : vector<2x96xf32>
    %178 = arith.divf %176, %177 : vector<2x96xf32>
    %179 = vector.extract_strided_slice %172 {offsets = [0, 96], sizes = [2, 32], strides = [1, 1]} : vector<2x128xf32> to vector<2x32xf32>
    %180 = math.tanh %179 : vector<2x32xf32>
    %181 = vector.extract_strided_slice %178 {offsets = [0, 0], sizes = [2, 32], strides = [1, 1]} : vector<2x96xf32> to vector<2x32xf32>
    %182 = vector.extract_strided_slice %178 {offsets = [0, 32], sizes = [2, 32], strides = [1, 1]} : vector<2x96xf32> to vector<2x32xf32>
    %183 = vector.extract_strided_slice %178 {offsets = [0, 64], sizes = [2, 32], strides = [1, 1]} : vector<2x96xf32> to vector<2x32xf32>
    %184 = arith.mulf %182, %166 : vector<2x32xf32>
    %185 = arith.mulf %181, %180 : vector<2x32xf32>
    %186 = arith.addf %184, %185 : vector<2x32xf32>
    %187 = math.tanh %186 : vector<2x32xf32>
    %188 = arith.mulf %183, %187 : vector<2x32xf32>
    %189 = vector.extract_strided_slice %46 {offsets = [0, 7, 0], sizes = [2, 1, 128], strides = [1, 1, 1]} : vector<2x8x128xf32> to vector<2x1x128xf32>
    %190 = vector.shape_cast %189 : vector<2x1x128xf32> to vector<2x128xf32>
    %cst_42 = arith.constant dense<0.000000e+00> : vector<2x128xf32>
    %191 = tpu.matmul %188, %1, %cst_42 {dimension_numbers = #tpu.dot_dimension_numbers<[1], [0], [0], [1], [0, 0, 1, 1], [], []>} : vector<2x32xf32>, vector<32x128xf32>, vector<2x128xf32> -> vector<2x128xf32>
    %192 = arith.addf %190, %191 : vector<2x128xf32>
    %193 = vector.extract_strided_slice %192 {offsets = [0, 0], sizes = [2, 96], strides = [1, 1]} : vector<2x128xf32> to vector<2x96xf32>
    %194 = arith.negf %193 : vector<2x96xf32>
    %195 = math.exp %194 : vector<2x96xf32>
    %cst_43 = arith.constant 1.000000e+00 : f32
    %196 = vector.broadcast %cst_43 : f32 to vector<2x96xf32>
    %197 = arith.addf %196, %195 : vector<2x96xf32>
    %198 = arith.divf %196, %197 : vector<2x96xf32>
    %199 = vector.extract_strided_slice %192 {offsets = [0, 96], sizes = [2, 32], strides = [1, 1]} : vector<2x128xf32> to vector<2x32xf32>
    %200 = math.tanh %199 : vector<2x32xf32>
    %201 = vector.extract_strided_slice %198 {offsets = [0, 0], sizes = [2, 32], strides = [1, 1]} : vector<2x96xf32> to vector<2x32xf32>
    %202 = vector.extract_strided_slice %198 {offsets = [0, 32], sizes = [2, 32], strides = [1, 1]} : vector<2x96xf32> to vector<2x32xf32>
    %203 = vector.extract_strided_slice %198 {offsets = [0, 64], sizes = [2, 32], strides = [1, 1]} : vector<2x96xf32> to vector<2x32xf32>
    %204 = arith.mulf %202, %186 : vector<2x32xf32>
    %205 = arith.mulf %201, %200 : vector<2x32xf32>
    %206 = arith.addf %204, %205 : vector<2x32xf32>
    %207 = math.tanh %206 : vector<2x32xf32>
    %208 = arith.mulf %203, %207 : vector<2x32xf32>
    %cst_44 = arith.constant dense<0.000000e+00> : vector<2x32xf32>
    %209 = tpu.matmul %208, %2, %cst_44 {dimension_numbers = #tpu.dot_dimension_numbers<[1], [0], [0], [1], [0, 0, 1, 1], [], []>} : vector<2x32xf32>, vector<32x32xf32>, vector<2x32xf32> -> vector<2x32xf32>
    %210 = vector.broadcast %8 : vector<1x32xf32> to vector<2x32xf32>
    %211 = arith.addf %209, %210 : vector<2x32xf32>
    %cst_45 = arith.constant 0.000000e+00 : f32
    %212 = vector.broadcast %cst_45 : f32 to vector<2x32xf32>
    %213 = arith.maximumf %211, %212 : vector<2x32xf32>
    %cst_46 = arith.constant dense<0.000000e+00> : vector<2xf32>
    %214 = vector.multi_reduction <add>, %213, %cst_46 [1] : vector<2x32xf32> to vector<2xf32>
    %215 = vector.shape_cast %214 : vector<2xf32> to vector<2x1xf32>
    %cst_47 = arith.constant 3.200000e+01 : f32
    %216 = vector.broadcast %cst_47 : f32 to vector<2x1xf32>
    %217 = arith.divf %215, %216 : vector<2x1xf32>
    %218 = vector.broadcast %217 : vector<2x1xf32> to vector<2x32xf32>
    %219 = arith.subf %213, %218 : vector<2x32xf32>
    %220 = arith.mulf %219, %219 : vector<2x32xf32>
    %cst_48 = arith.constant dense<0.000000e+00> : vector<2xf32>
    %221 = vector.multi_reduction <add>, %220, %cst_48 [1] : vector<2x32xf32> to vector<2xf32>
    %222 = vector.shape_cast %221 : vector<2xf32> to vector<2x1xf32>
    %cst_49 = arith.constant 3.200000e+01 : f32
    %223 = vector.broadcast %cst_49 : f32 to vector<2x1xf32>
    %224 = arith.divf %222, %223 : vector<2x1xf32>
    %225 = vector.broadcast %217 : vector<2x1xf32> to vector<2x32xf32>
    %226 = arith.subf %213, %225 : vector<2x32xf32>
    %cst_50 = arith.constant 9.99999974E-6 : f32
    %227 = vector.broadcast %cst_50 : f32 to vector<2x1xf32>
    %228 = arith.addf %224, %227 : vector<2x1xf32>
    %229 = math.rsqrt %228 : vector<2x1xf32>
    %230 = vector.broadcast %229 : vector<2x1xf32> to vector<2x32xf32>
    %231 = arith.mulf %226, %230 : vector<2x32xf32>
    %232 = vector.broadcast %9 : vector<1x32xf32> to vector<2x32xf32>
    %233 = arith.mulf %231, %232 : vector<2x32xf32>
    %234 = vector.broadcast %10 : vector<1x32xf32> to vector<2x32xf32>
    %235 = arith.addf %233, %234 : vector<2x32xf32>
    %cst_51 = arith.constant dense<0.000000e+00> : vector<2x32xf32>
    %236 = tpu.matmul %235, %3, %cst_51 {dimension_numbers = #tpu.dot_dimension_numbers<[1], [0], [0], [1], [0, 0, 1, 1], [], []>} : vector<2x32xf32>, vector<32x32xf32>, vector<2x32xf32> -> vector<2x32xf32>
    %237 = vector.broadcast %11 : vector<1x32xf32> to vector<2x32xf32>
    %238 = arith.addf %236, %237 : vector<2x32xf32>
    %cst_52 = arith.constant 0.000000e+00 : f32
    %239 = vector.broadcast %cst_52 : f32 to vector<2x32xf32>
    %240 = arith.maximumf %238, %239 : vector<2x32xf32>
    %241 = vector.extract_strided_slice %240 {offsets = [0, 0], sizes = [2, 16], strides = [1, 1]} : vector<2x32xf32> to vector<2x16xf32>
    %cst_53 = arith.constant dense<0.000000e+00> : vector<2xf32>
    %242 = vector.multi_reduction <add>, %241, %cst_53 [1] : vector<2x16xf32> to vector<2xf32>
    %243 = vector.shape_cast %242 : vector<2xf32> to vector<2x1xf32>
    %cst_54 = arith.constant 1.600000e+01 : f32
    %244 = vector.broadcast %cst_54 : f32 to vector<2x1xf32>
    %245 = arith.divf %243, %244 : vector<2x1xf32>
    %246 = vector.broadcast %245 : vector<2x1xf32> to vector<2x16xf32>
    %247 = arith.subf %241, %246 : vector<2x16xf32>
    %248 = arith.mulf %247, %247 : vector<2x16xf32>
    %cst_55 = arith.constant dense<0.000000e+00> : vector<2xf32>
    %249 = vector.multi_reduction <add>, %248, %cst_55 [1] : vector<2x16xf32> to vector<2xf32>
    %250 = vector.shape_cast %249 : vector<2xf32> to vector<2x1xf32>
    %cst_56 = arith.constant 1.600000e+01 : f32
    %251 = vector.broadcast %cst_56 : f32 to vector<2x1xf32>
    %252 = arith.divf %250, %251 : vector<2x1xf32>
    %253 = vector.broadcast %245 : vector<2x1xf32> to vector<2x16xf32>
    %254 = arith.subf %241, %253 : vector<2x16xf32>
    %cst_57 = arith.constant 9.99999974E-6 : f32
    %255 = vector.broadcast %cst_57 : f32 to vector<2x1xf32>
    %256 = arith.addf %252, %255 : vector<2x1xf32>
    %257 = math.rsqrt %256 : vector<2x1xf32>
    %258 = vector.broadcast %257 : vector<2x1xf32> to vector<2x16xf32>
    %259 = arith.mulf %254, %258 : vector<2x16xf32>
    %260 = vector.broadcast %12 : vector<1x16xf32> to vector<2x16xf32>
    %261 = arith.mulf %259, %260 : vector<2x16xf32>
    %262 = vector.broadcast %13 : vector<1x16xf32> to vector<2x16xf32>
    %263 = arith.addf %261, %262 : vector<2x16xf32>
    %264 = vector.extract_strided_slice %240 {offsets = [0, 16], sizes = [2, 16], strides = [1, 1]} : vector<2x32xf32> to vector<2x16xf32>
    %cst_58 = arith.constant dense<0.000000e+00> : vector<2xf32>
    %265 = vector.multi_reduction <add>, %264, %cst_58 [1] : vector<2x16xf32> to vector<2xf32>
    %266 = vector.shape_cast %265 : vector<2xf32> to vector<2x1xf32>
    %cst_59 = arith.constant 1.600000e+01 : f32
    %267 = vector.broadcast %cst_59 : f32 to vector<2x1xf32>
    %268 = arith.divf %266, %267 : vector<2x1xf32>
    %269 = vector.broadcast %268 : vector<2x1xf32> to vector<2x16xf32>
    %270 = arith.subf %264, %269 : vector<2x16xf32>
    %271 = arith.mulf %270, %270 : vector<2x16xf32>
    %cst_60 = arith.constant dense<0.000000e+00> : vector<2xf32>
    %272 = vector.multi_reduction <add>, %271, %cst_60 [1] : vector<2x16xf32> to vector<2xf32>
    %273 = vector.shape_cast %272 : vector<2xf32> to vector<2x1xf32>
    %cst_61 = arith.constant 1.600000e+01 : f32
    %274 = vector.broadcast %cst_61 : f32 to vector<2x1xf32>
    %275 = arith.divf %273, %274 : vector<2x1xf32>
    %276 = vector.broadcast %268 : vector<2x1xf32> to vector<2x16xf32>
    %277 = arith.subf %264, %276 : vector<2x16xf32>
    %cst_62 = arith.constant 9.99999974E-6 : f32
    %278 = vector.broadcast %cst_62 : f32 to vector<2x1xf32>
    %279 = arith.addf %275, %278 : vector<2x1xf32>
    %280 = math.rsqrt %279 : vector<2x1xf32>
    %281 = vector.broadcast %280 : vector<2x1xf32> to vector<2x16xf32>
    %282 = arith.mulf %277, %281 : vector<2x16xf32>
    %283 = vector.broadcast %14 : vector<1x16xf32> to vector<2x16xf32>
    %284 = arith.mulf %282, %283 : vector<2x16xf32>
    %285 = vector.broadcast %15 : vector<1x16xf32> to vector<2x16xf32>
    %286 = arith.addf %284, %285 : vector<2x16xf32>
    %287 = tpu.concatenate %263, %286 in 1 : vector<2x16xf32>, vector<2x16xf32> -> vector<2x32xf32>
    %cst_63 = arith.constant dense<0.000000e+00> : vector<2x128xf32>
    %288 = tpu.matmul %287, %4, %cst_63 {dimension_numbers = #tpu.dot_dimension_numbers<[1], [0], [0], [1], [0, 0, 1, 1], [], []>} : vector<2x32xf32>, vector<32x128xf32>, vector<2x128xf32> -> vector<2x128xf32>
    %289 = vector.broadcast %16 : vector<1x128xf32> to vector<2x128xf32>
    %290 = arith.addf %288, %289 : vector<2x128xf32>
    %291 = tpu.iota {dimensions = array<i32: 1>} : vector<2x128xi32>
    %c5_i32 = arith.constant 5 : i32
    %292 = vector.broadcast %c5_i32 : i32 to vector<2x128xi32>
    %293 = arith.cmpi slt, %291, %292 : vector<2x128xi32>
    %cst_64 = arith.constant -1.000000e+30 : f32
    %294 = vector.broadcast %cst_64 : f32 to vector<2x128xf32>
    %295 = arith.select %293, %290, %294 : vector<2x128xi1>, vector<2x128xf32>
    %cst_65 = arith.constant dense<0xFF800000> : vector<2xf32>
    %296 = vector.multi_reduction <maximumf>, %295, %cst_65 [1] : vector<2x128xf32> to vector<2xf32>
    %297 = vector.shape_cast %296 : vector<2xf32> to vector<2x1xf32>
    %298 = vector.broadcast %297 : vector<2x1xf32> to vector<2x128xf32>
    %299 = arith.subf %295, %298 : vector<2x128xf32>
    %300 = math.exp %299 : vector<2x128xf32>
    %cst_66 = arith.constant dense<0.000000e+00> : vector<2xf32>
    %301 = vector.multi_reduction <add>, %300, %cst_66 [1] : vector<2x128xf32> to vector<2xf32>
    %302 = vector.shape_cast %301 : vector<2xf32> to vector<2x1xf32>
    %303 = tpu.reciprocal %302 : vector<2x1xf32> -> vector<2x1xf32>
    %304 = vector.broadcast %303 : vector<2x1xf32> to vector<2x128xf32>
    %305 = arith.mulf %300, %304 : vector<2x128xf32>
    %c5_i32_67 = arith.constant 5 : i32
    %306 = vector.broadcast %c5_i32_67 : i32 to vector<2x128xi32>
    %307 = arith.cmpi eq, %291, %306 : vector<2x128xi32>
    %308 = arith.select %307, %290, %305 : vector<2x128xi1>, vector<2x128xf32>
    %c0_68 = arith.constant 0 : index
    %c0_69 = arith.constant 0 : index
    %309 = vector.load %arg4[%c0_68, %c0_69] : memref<2x128xf32, #tpu.memory_space<vmem>>, vector<2x128xf32>
    tpu.vector_store %arg4[%c0_68, %c0_69], %308 {strides = array<i32>} : memref<2x128xf32, #tpu.memory_space<vmem>>, vector<2x128xf32>,
    return
  }
  func.func @transform_0(%arg0: i32) -> (i32, i32, i32) {
    %c0_i32 = arith.constant 0 : i32
    %c0_i32_0 = arith.constant 0 : i32
    %c0_i32_1 = arith.constant 0 : i32
    return %arg0, %c0_i32, %c0_i32_0 : i32, i32, i32
  }
  func.func @transform_1(%arg0: i32) -> (i32, i32) {
    %c0_i32 = arith.constant 0 : i32
    %c0_i32_0 = arith.constant 0 : i32
    %c0_i32_1 = arith.constant 0 : i32
    return %c0_i32, %c0_i32_0 : i32, i32
  }
  func.func @transform_2(%arg0: i32) -> (i32, i32) {
    %c0_i32 = arith.constant 0 : i32
    %c0_i32_0 = arith.constant 0 : i32
    %c0_i32_1 = arith.constant 0 : i32
    return %c0_i32, %c0_i32_0 : i32, i32
  }
  func.func @transform_3(%arg0: i32) -> (i32, i32) {
    %c0_i32 = arith.constant 0 : i32
    %c0_i32_0 = arith.constant 0 : i32
    return %arg0, %c0_i32 : i32, i32
  }
}

</mosaic_0001>

<bundles_post_ra>
// kernel: tpu_custom_call.1
= control target key start
LH: loop header
LB: loop body
LE: loop exit
PB: predicated region body
PF: predicated region fallthrough
CT: control target
= control target key end

     0   :  { %8 = vsyncpa [#allocation3], 0  ;;  %s1859_s0 = inlined_call_operand.hbm [shape: f32[2,8,16], index: 0, kind: input, shape index: {}]   ;;  %s1860_s1 = inlined_call_operand.hbm [shape: f32[144,128], index: 1, kind: input, shape index: {}]   ;;  %s1861_s2 = inlined_call_operand.hbm [shape: f32[12,128], index: 2, kind: input, shape index: {}]   ;;  %s1862_s3 = inlined_call_operand.hbm [shape: f32[2,128], index: 3, kind: output, shape index: {}]  }
   0x1   :  { %9 = vsyncpa [#allocation6], 0 }
   0x2   :  { %10 = vsyncpa [#allocation4], 0  ;;  %s28_s14 = sshll.u32 %s1860_s1, 4  ;;  %s1631_s15 = smov [#allocation5]   ;;  %s29_s14 = int_to_ptr.hbm [resolvable:$true] %s28_s14 }
   0x3   :  { %s30_s16 = sshll.u32 %s1631_s15, 4  ;;  %s15_s19 = sshll.u32 %s1859_s0, 4  ;;  %s31_s16 = int_to_ptr.vmem [resolvable:$true] %s30_s16  ;;  %s16_s19 = int_to_ptr.hbm [resolvable:$true] %s15_s19 }
   0x4   :  { %s1632_s20 = smov 128   ;;  %s1633_s21 = smov 8  }
   0x5   :  { %36 = dma.hbm_to_vmem [thread:$0]  %s29_s14, 2304, %s31_s16, [#allocation6], %s1632_s20, %s1632_s20, %s1633_s21  }
   0x6   :  { %s1634_s22 = smov [#allocation2]   ;;  %s41_s26 = sshll.u32 %s1861_s2, 4  ;;  %s42_s26 = int_to_ptr.hbm [resolvable:$true] %s41_s26 }
   0x7   :  { %s17_s23 = sshll.u32 %s1634_s22, 4  ;;  %s1635_s1 = smov [#allocation7]   ;;  %s18_s23 = int_to_ptr.vmem [resolvable:$true] %s17_s23 }
   0x8   :  { %23 = dma.hbm_to_vmem [thread:$0]  %s16_s19, 256, %s18_s23, [#allocation3], %s1632_s20, %s1632_s20, %s1633_s21  }
   0x9   :  { %s43_s27 = sshll.u32 %s1635_s1, 4  ;;  %s44_s27 = int_to_ptr.vmem [resolvable:$true] %s43_s27 }
   0xa   :  { %49 = dma.hbm_to_vmem [thread:$0]  %s42_s26, 256, %s44_s27, [#allocation6], %s1632_s20, %s1632_s20, %s1633_s21  }
   0xb   :  { %1625 = dma.done.wait [#allocation3], 256  }
   0xc   :  { %1626 = vsyncadd [#allocation3], 4294967040 }
   0xd   :  { %1627 = dma.done.wait [#allocation6], 2560  }
   0xe   :  { %1628 = vsyncadd [#allocation6], 4294964736  ;;  %vm94_vm0 = vcmask 130048   ;;  %v92_v0 = vld [vmem:[#allocation2] sm:$0xff]  ;;  %v93_v2 = vld [vmem:[#allocation2 + $0x8] sm:$0xff]  ;;  %v1636_v4 = vmov 16.0  }
   0xf   :  { %v95_v1 = vsel %vm94_vm0, %v92_v0, 0.0  ;;  %v98_v3 = vsel %vm94_vm0, %v93_v2, 0.0  ;;  %1383 = vrcp.f32 %v1636_v4  ;;  %v67_v21 = vld [vmem:[#allocation5 + $0x28] sm:$0xff]  ;;  %v66_v23 = vld [vmem:[#allocation5 + $0x20] sm:$0xff]  ;;  %v65_v25 = vld [vmem:[#allocation5 + $0x18] sm:$0xff]  ;;  %v1637_v27 = vmov 0.0  }
  0x10   :  { %96 = vadd.xlane.f32.xlu0 %v95_v1  ;;  %198 = vmatpush.msra.mxu1 %v67_v21  ;;  %v63_v22 = vld [vmem:[#allocation5 + $0x8] sm:$0xff]  ;;  %v62_v24 = vld [vmem:[#allocation5] sm:$0xff]  ;;  %v64_v26 = vld [vmem:[#allocation5 + $0x10] sm:$0xff]  ;;  %s1638_s0 = smov 32   ;;  %s1639_s2 = smov 64  }
  0x11   :  { %307 = vmatpush.msra.mxu2 %v67_v21  ;;  %421 = vmatpush.msra.mxu3 %v67_v21  ;;  %v1371_v42 = vld [vmem:[#allocation7] ss:$0 sm:$0xff]  ;;  %v1372_v46 = vld [vmem:[#allocation7 + $0x1] ss:$0 sm:$0xff]  ;;  %v1373_v58 = vld [vmem:[#allocation7 + $0x2] ss:$0 sm:$0xff] }
  0x12   :  { %173 = vmatpush.msra.mxu0 %v63_v22  ;;  %199 = vmatpush.msra.mxu1 %v66_v23  ;;  %s1641_s28 = smov 112   ;;  %s1642_s29 = smov 16  }
  0x13   :  { %308 = vmatpush.msra.mxu2 %v66_v23  ;;  %422 = vmatpush.msra.mxu3 %v66_v23  ;;  %s1643_s30 = smov [#allocation8]   ;;  %s1319_s7 = sshll.u32 %s1862_s3, 4  ;;  %s1320_s7 = int_to_ptr.hbm [resolvable:$true] %s1319_s7 }
  0x14   :  { %174 = vmatpush.msra.mxu0 %v62_v24  ;;  %200 = vmatpush.msra.mxu1 %v65_v25  ;;  %s1317_s4 = sshll.u32 %s1643_s30, 4  ;;  %s1318_s4 = int_to_ptr.vmem [resolvable:$true] %s1317_s4 }
  0x15   :  { %v1384_v5 = vpop.eup %1383  ;;  %309 = vmatpush.msra.mxu2 %v65_v25  ;;  %423 = vmatpush.msra.mxu3 %v65_v25 }
  0x16   :  { %v102_v6 = vmul.f32 16.0, %v1384_v5  ;;  %vm106_vm1 = vweird.f32 %v1384_v5  ;;  %201 = vmatpush.msra.mxu1 %v64_v26  ;;  %885 = vmatpush.msrb.mxu0 %v67_v21 }
  0x17   :  { %202 = vmatmul.f32.vlgmr.msra.gmra.mxu1 %v1637_v27  ;;  %310 = vmatpush.msra.mxu2 %v64_v26 }
  0x18   :  { %99 = vadd.xlane.f32.xlu0 %v98_v3  ;;  %v103_v7 = vsub.f32 1.0, %v102_v6  ;;  %424 = vmatpush.msra.mxu3 %v64_v26 }
  0x19   :  { %537 = vmatpush.msrb.mxu1 %v67_v21  ;;  %653 = vmatpush.msrb.mxu2 %v67_v21 }
  0x1a   :  { %v104_v8 = vmul.f32 %v1384_v5, %v103_v7  ;;  %769 = vmatpush.msrb.mxu3 %v67_v21  ;;  %886 = vmatpush.msrb.mxu0 %v66_v23 }
  0x1b   :  { %538 = vmatpush.msrb.mxu1 %v66_v23  ;;  %654 = vmatpush.msrb.mxu2 %v66_v23 }
  0x1c   :  { %v105_v9 = vadd.f32 %v1384_v5, %v104_v8  ;;  %770 = vmatpush.msrb.mxu3 %v66_v23  ;;  %887 = vmatpush.msrb.mxu0 %v65_v25 }
  0x1d   :  { %539 = vmatpush.msrb.mxu1 %v65_v25  ;;  %655 = vmatpush.msrb.mxu2 %v65_v25 }
  0x1e   :  { %v1675_v10 = vsel %vm106_vm1, %v1384_v5, %v105_v9  ;;  %771 = vmatpush.msrb.mxu3 %v65_v25  ;;  %888 = vmatpush.msrb.mxu0 %v64_v26  ;;  %vm289_vm1 = vcmask 1041409  }
  0x1f   :  { %540 = vmatpush.msrb.mxu1 %v64_v26  ;;  %656 = vmatpush.msrb.mxu2 %v64_v26 }
  0x20   :  { %772 = vmatpush.msrb.mxu3 %v64_v26 }
  0x21   :  { %1001 = vmatpush.msra.mxu1 %v67_v21 }
  0x23   :  { %1002 = vmatpush.msra.mxu1 %v66_v23 }
  0x25   :  { %1003 = vmatpush.msra.mxu1 %v65_v25 }
  0x27   :  { %1004 = vmatpush.msra.mxu1 %v64_v26 }
  0x83   :  { %v97_v11 = vpop.xlane.xlu0 %96 }
  0x84   :  { %v108_v12 = vmul.f32 %v1675_v10, %v97_v11 }
  0x86   :  { %v1678_v13 = vsub.f32 %v92_v0, %v108_v12 }
  0x88   :  { %v112_v14 = vmul.f32 %v1678_v13, %v1678_v13 }
  0x8a   :  { %v114_v15 = vsel %vm94_vm0, %v112_v14, 0.0 }
  0x8b   :  { %115 = vadd.xlane.f32.xlu1 %v114_v15  ;;  %v100_v16 = vpop.xlane.xlu0 %99 }
  0x8c   :  { %v109_v17 = vmul.f32 %v1675_v10, %v100_v16 }
  0x8e   :  { %v1684_v18 = vsub.f32 %v93_v2, %v109_v17 }
  0x90   :  { %v113_v19 = vmul.f32 %v1684_v18, %v1684_v18 }
  0x92   :  { %v117_v20 = vsel %vm94_vm0, %v113_v19, 0.0 }
  0x93   :  { %118 = vadd.xlane.f32.xlu1 %v117_v20 }
  0x94   :  { %v203_v57 = vpop.f32.mrf.mxu1 }
  0x95   :  { %v207_v59 = vrot.slane %v203_v57, 1 }
  0xfe   :  { %v116_v28 = vpop.xlane.xlu1 %115 }
  0xff   :  { %v120_v29 = vmul.f32 %v116_v28, %v1675_v10 }
 0x101   :  { %v122_v30 = vadd.f32 1e-05, %v120_v29 }
 0x103   :  { %1385 = vrsqrt.f32 %v122_v30  ;;  %vm130_vm3 = vweird.f32 %v122_v30 }
 0x106   :  { %v119_v31 = vpop.xlane.xlu1 %118 }
 0x107   :  { %v121_v32 = vmul.f32 %v119_v31, %v1675_v10 }
 0x109   :  { %v1386_v33 = vpop.eup %1385  ;;  %v123_v34 = vadd.f32 1e-05, %v121_v32 }
 0x10a   :  { %v125_v35 = vmul.f32 %v1386_v33, %v122_v30  ;;  %vm131_vm2 = vweird.f32 %v1386_v33 }
 0x10b   :  { %1387 = vrsqrt.f32 %v123_v34  ;;  %vm132_vm4 = vmor %vm130_vm3, %vm131_vm2  ;;  %vm140_vm6 = vweird.f32 %v123_v34  ;;  %vm182_vm2 = vcmask 261120  }
 0x10c   :  { %v126_v36 = vmul.f32 %v1386_v33, %v125_v35 }
 0x10e   :  { %v127_v37 = vmul.f32 0.5, %v126_v36 }
 0x110   :  { %v128_v38 = vsub.f32 1.5, %v127_v37 }
 0x111   :  { %v1388_v39 = vpop.eup %1387 }
 0x112   :  { %v129_v40 = vmul.f32 %v1386_v33, %v128_v38  ;;  %v135_v41 = vmul.f32 %v1388_v39, %v123_v34  ;;  %vm141_vm5 = vweird.f32 %v1388_v39 }
 0x113   :  { %vm142_vm7 = vmor %vm140_vm6, %vm141_vm5 }
 0x114   :  { %v133_v43 = vsel %vm132_vm4, %v1386_v33, %v129_v40  ;;  %v136_v44 = vmul.f32 %v1388_v39, %v135_v41 }
 0x115   :  { %v144_v45 = vmul.f32 %v133_v43, %v1678_v13 }
 0x116   :  { %v137_v47 = vmul.f32 0.5, %v136_v44 }
 0x117   :  { %v147_v48 = vmul.f32 %v1371_v42, %v144_v45 }
 0x118   :  { %v138_v49 = vsub.f32 1.5, %v137_v47 }
 0x119   :  { %v150_v50 = vadd.f32 %v1372_v46, %v147_v48 }
 0x11a   :  { %v139_v51 = vmul.f32 %v1388_v39, %v138_v49 }
 0x11b   :  { %1330 = vmatmul.msk.f32.vlgmr.msra.gmra.mxu0 %vm94_vm0, %v150_v50 }
 0x11c   :  { %v143_v52 = vsel %vm142_vm7, %v1388_v39, %v139_v51 }
 0x11d   :  { %v145_v53 = vmul.f32 %v143_v52, %v1684_v18 }
 0x11f   :  { %v148_v54 = vmul.f32 %v1371_v42, %v145_v53 }
 0x121   :  { %v151_v55 = vadd.f32 %v1372_v46, %v148_v54 }
 0x123   :  { %1331 = vmatmul.msk.f32.gmra.mxu0 %vm94_vm0, %v151_v55 }
 0x198   :  { %v176_v56 = vpop.f32.mrf.mxu0 }
 0x199   :  { %v1698_v63 = vadd.f32 %v1373_v58, %v176_v56 }
 0x19b   :  { %v210_v0 = vadd.f32 %v203_v57, %v1698_v63 }
 0x19d   :  { %v1332_v4 = vmul.f32 -1.442695, %v210_v0 }
 0x1a0   :  { %v179_v60 = vpop.f32.mrf.mxu0 }
 0x1a1   :  { %v1695_v61 = vadd.f32 %v1373_v58, %v179_v60 }
 0x1a3   :  { %v211_v62 = vadd.f32 %v207_v59, %v1695_v61 }
 0x1a5   :  { %1389 = vtanh.f32 %v211_v62  ;;  %v1333_v3 = vmul.f32 -1.442695, %v211_v62 }
 0x1a6   :  { %1391 = vtanh.f32 %v210_v0 }
 0x1a7   :  { %1393 = vpow2.f32 %v1333_v3 }
 0x1a8   :  { %1395 = vpow2.f32 %v1332_v4 }
 0x1ab   :  { %v1390_v1 = vpop.eup %1389 }
 0x1ac   :  { %258 = vrot.lane.b32.xlu2 %v1390_v1, %s1638_s0  ;;  %v1392_v2 = vpop.eup %1391 }
 0x1ad   :  { %v1394_v5 = vpop.eup %1393 }
 0x1ae   :  { %v219_v6 = vadd.f32 1.0, %v1394_v5  ;;  %v1396_v7 = vpop.eup %1395 }
 0x1af   :  { %v218_v8 = vadd.f32 1.0, %v1396_v7 }
 0x1b0   :  { %1397 = vrcp.f32 %v219_v6  ;;  %v246_v18 = vand.u32 2147483648, %v219_v6  ;;  %vm240_vm9 = vweird.f32 %v219_v6  ;;  %v244_v19 = vand.u32 2147483647, %v219_v6 }
 0x1b1   :  { %1399 = vrcp.f32 %v218_v8  ;;  %v231_v27 = vand.u32 2147483648, %v218_v8  ;;  %vm225_vm13 = vweird.f32 %v218_v8  ;;  %v229_v28 = vand.u32 2147483647, %v218_v8 }
 0x1b2   :  { %v247_v22 = vor.u32 1.1754944e-38, %v246_v18  ;;  %vm245_vm11 = vcmp.eq.f32.partialorder %v244_v19, 8.507059e+37 }
 0x1b3   :  { %v232_v30 = vor.u32 1.1754944e-38, %v231_v27  ;;  %vm230_vm15 = vcmp.eq.f32.partialorder %v229_v28, 8.507059e+37 }
 0x1b4   :  { %256 = vrot.lane.b32.xlu2 %v1392_v2, %s1638_s0 }
 0x1b6   :  { %v1398_v9 = vpop.eup %1397 }
 0x1b7   :  { %v236_v11 = vmul.f32 %v1398_v9, %v219_v6  ;;  %v1400_v13 = vpop.eup %1399  ;;  %vm241_vm8 = vweird.f32 %v1398_v9 }
 0x1b8   :  { %v221_v15 = vmul.f32 %v1400_v13, %v218_v8  ;;  %vm242_vm10 = vmor %vm240_vm9, %vm241_vm8  ;;  %vm226_vm12 = vweird.f32 %v1400_v13 }
 0x1b9   :  { %v237_v12 = vsub.f32 1.0, %v236_v11  ;;  %vm227_vm14 = vmor %vm225_vm13, %vm226_vm12 }
 0x1ba   :  { %v222_v17 = vsub.f32 1.0, %v221_v15 }
 0x1bb   :  { %v238_v14 = vmul.f32 %v1398_v9, %v237_v12 }
 0x1bc   :  { %v223_v21 = vmul.f32 %v1400_v13, %v222_v17 }
 0x1bd   :  { %v239_v16 = vadd.f32 %v1398_v9, %v238_v14 }
 0x1be   :  { %v224_v26 = vadd.f32 %v1400_v13, %v223_v21 }
 0x1bf   :  { %v243_v20 = vsel %vm242_vm10, %v1398_v9, %v239_v16 }
 0x1c0   :  { %v248_v24 = vsel %vm245_vm11, %v247_v22, %v243_v20  ;;  %v228_v29 = vsel %vm227_vm14, %v1400_v13, %v224_v26 }
 0x1c1   :  { %v233_v32 = vsel %vm230_vm15, %v232_v30, %v228_v29  ;;  %v253_v34 = vmul.f32 0.0, %v248_v24 }
 0x1c2   :  { %v252_v37 = vmul.f32 0.0, %v233_v32 }
 0x206   :  { %v259_v23 = vpop.permute.xlu2 %258 }
 0x207   :  { %v263_v25 = vmul.f32 %v259_v23, %v248_v24 }
 0x209   :  { %268 = vrot.lane.b32.xlu0 %v263_v25, %s1638_s0 }
 0x20e   :  { %v257_v31 = vpop.permute.xlu2 %256 }
 0x20f   :  { %v262_v33 = vmul.f32 %v257_v31, %v233_v32 }
 0x211   :  { %266 = vrot.lane.b32.xlu1 %v262_v33, %s1638_s0 }
 0x27b   :  { %v269_v35 = vpop.permute.xlu0 %268 }
 0x27c   :  { %v1705_v36 = vadd.f32 %v269_v35, %v253_v34 }
 0x27e   :  { %1401 = vtanh.f32 %v1705_v36 }
 0x283   :  { %v267_v38 = vpop.permute.xlu1 %266 }
 0x284   :  { %v1402_v39 = vpop.eup %1401  ;;  %v1708_v40 = vadd.f32 %v267_v38, %v252_v37 }
 0x285   :  { %280 = vrot.lane.b32.xlu2 %v1402_v39, %s1638_s0 }
 0x286   :  { %1403 = vtanh.f32 %v1708_v40  ;;  %v363_v29 = vrot.slane %v1708_v40, 7 }
 0x28c   :  { %v1404_v41 = vpop.eup %1403 }
 0x28d   :  { %278 = vrot.lane.b32.xlu2 %v1404_v41, %s1638_s0 }
 0x2df   :  { %v281_v42 = vpop.permute.xlu2 %280 }
 0x2e0   :  { %v285_v43 = vmul.f32 %v281_v42, %v248_v24  ;;  %v364_v24 = vrot.slane %v1705_v36, 7 }
 0x2e2   :  { %v288_v45 = vrot.slane %v285_v43, 7 }
 0x2e7   :  { %v279_v44 = vpop.permute.xlu2 %278 }
 0x2e8   :  { %v284_v46 = vmul.f32 %v279_v44, %v233_v32 }
 0x2ea   :  { %v290_v47 = vsel %vm289_vm1, %v288_v45, %v284_v46 }
 0x2eb   :  { %291 = vrot.lane.b32.xlu2 %v290_v47, %s1639_s2 }
 0x345   :  { %v292_v48 = vpop.permute.xlu2 %291 }
 0x346   :  { %1334 = vmatmul.msk.f32.vlgmr.msra.gmra.mxu2 %vm182_vm2, %v292_v48 }
 0x3c9   :  { %v312_v49 = vpop.f32.mrf.mxu2 }
 0x3ca   :  { %v316_v50 = vrot.slane %v312_v49, 7  ;;  %v320_v51 = vadd.f32 %v312_v49, %v1695_v61 }
 0x3cc   :  { %v319_v52 = vadd.f32 %v316_v50, %v1698_v63  ;;  %1405 = vtanh.f32 %v320_v51  ;;  %v1336_v55 = vmul.f32 -1.442695, %v320_v51 }
 0x3ce   :  { %1407 = vtanh.f32 %v319_v52  ;;  %v1335_v60 = vmul.f32 -1.442695, %v319_v52 }
 0x3cf   :  { %1409 = vpow2.f32 %v1336_v55 }
 0x3d2   :  { %v1406_v53 = vpop.eup %1405 }
 0x3d3   :  { %373 = vrot.lane.b32.xlu2 %v1406_v53, %s1638_s0 }
 0x3d4   :  { %v1408_v54 = vpop.eup %1407 }
 0x3d5   :  { %371 = vrot.lane.b32.xlu0 %v1408_v54, %s1638_s0  ;;  %v1410_v56 = vpop.eup %1409 }
 0x3d6   :  { %v328_v57 = vadd.f32 1.0, %v1410_v56 }
 0x3d8   :  { %1411 = vrcp.f32 %v328_v57  ;;  %v355_v3 = vand.u32 2147483648, %v328_v57  ;;  %vm349_vm4 = vweird.f32 %v328_v57  ;;  %v353_v5 = vand.u32 2147483647, %v328_v57 }
 0x3d9   :  { %1413 = vpow2.f32 %v1335_v60 }
 0x3da   :  { %v356_v7 = vor.u32 1.1754944e-38, %v355_v3  ;;  %vm354_vm6 = vcmp.eq.f32.partialorder %v353_v5, 8.507059e+37 }
 0x3de   :  { %v1412_v58 = vpop.eup %1411 }
 0x3df   :  { %v345_v59 = vmul.f32 %v1412_v58, %v328_v57  ;;  %v1414_v1 = vpop.eup %1413  ;;  %vm350_vm3 = vweird.f32 %v1412_v58 }
 0x3e0   :  { %v327_v4 = vadd.f32 1.0, %v1414_v1  ;;  %vm351_vm5 = vmor %vm349_vm4, %vm350_vm3 }
 0x3e1   :  { %v346_v62 = vsub.f32 1.0, %v345_v59 }
 0x3e2   :  { %1415 = vrcp.f32 %v327_v4  ;;  %v340_v17 = vand.u32 2147483648, %v327_v4  ;;  %vm334_vm8 = vweird.f32 %v327_v4  ;;  %v338_v18 = vand.u32 2147483647, %v327_v4 }
 0x3e3   :  { %v347_v0 = vmul.f32 %v1412_v58, %v346_v62 }
 0x3e4   :  { %v341_v20 = vor.u32 1.1754944e-38, %v340_v17  ;;  %vm339_vm10 = vcmp.eq.f32.partialorder %v338_v18, 8.507059e+37 }
 0x3e5   :  { %v348_v2 = vadd.f32 %v1412_v58, %v347_v0 }
 0x3e7   :  { %v352_v6 = vsel %vm351_vm5, %v1412_v58, %v348_v2 }
 0x3e8   :  { %v357_v9 = vsel %vm354_vm6, %v356_v7, %v352_v6  ;;  %v1416_v12 = vpop.eup %1415 }
 0x3e9   :  { %v330_v13 = vmul.f32 %v1416_v12, %v327_v4  ;;  %vm335_vm7 = vweird.f32 %v1416_v12  ;;  %v368_v25 = vmul.f32 %v364_v24, %v357_v9 }
 0x3ea   :  { %vm336_vm9 = vmor %vm334_vm8, %vm335_vm7 }
 0x3eb   :  { %v331_v14 = vsub.f32 1.0, %v330_v13 }
 0x3ed   :  { %v332_v15 = vmul.f32 %v1416_v12, %v331_v14 }
 0x3ef   :  { %v333_v16 = vadd.f32 %v1416_v12, %v332_v15 }
 0x3f1   :  { %v337_v19 = vsel %vm336_vm9, %v1416_v12, %v333_v16 }
 0x3f2   :  { %v342_v22 = vsel %vm339_vm10, %v341_v20, %v337_v19 }
 0x3f3   :  { %v367_v30 = vmul.f32 %v363_v29, %v342_v22 }
 0x42d   :  { %v374_v8 = vpop.permute.xlu2 %373 }
 0x42e   :  { %v378_v11 = vmul.f32 %v374_v8, %v357_v9 }
 0x430   :  { %383 = vrot.lane.b32.xlu0 %v378_v11, %s1638_s0 }
 0x447   :  { %v372_v21 = vpop.permute.xlu0 %371 }
 0x448   :  { %v377_v23 = vmul.f32 %v372_v21, %v342_v22 }
 0x44a   :  { %381 = vrot.lane.b32.xlu1 %v377_v23, %s1638_s0 }
 0x4a2   :  { %v384_v26 = vpop.permute.xlu0 %383 }
 0x4a3   :  { %v1723_v27 = vadd.f32 %v384_v26, %v368_v25 }
 0x4a5   :  { %1417 = vtanh.f32 %v1723_v27  ;;  %v479_v18 = vrot.slane %v1723_v27, 7 }
 0x4ab   :  { %v1418_v28 = vpop.eup %1417 }
 0x4ac   :  { %395 = vrot.lane.b32.xlu1 %v1418_v28, %s1638_s0 }
 0x4bc   :  { %v382_v31 = vpop.permute.xlu1 %381 }
 0x4bd   :  { %v1728_v32 = vadd.f32 %v382_v31, %v367_v30 }
 0x4bf   :  { %1419 = vtanh.f32 %v1728_v32  ;;  %v478_v17 = vrot.slane %v1728_v32, 7 }
 0x4c5   :  { %v1420_v33 = vpop.eup %1419 }
 0x4c6   :  { %393 = vrot.lane.b32.xlu2 %v1420_v33, %s1638_s0 }
 0x51e   :  { %v396_v34 = vpop.permute.xlu1 %395 }
 0x51f   :  { %v400_v37 = vmul.f32 %v396_v34, %v357_v9 }
 0x520   :  { %v394_v35 = vpop.permute.xlu2 %393 }
 0x521   :  { %v399_v36 = vmul.f32 %v394_v35, %v342_v22 }
 0x523   :  { %v403_v38 = vrot.slane %v399_v36, 1 }
 0x525   :  { %v404_v39 = vsel %vm289_vm1, %v400_v37, %v403_v38 }
 0x526   :  { %405 = vrot.lane.b32.xlu0 %v404_v39, %s1639_s2 }
 0x598   :  { %v406_v41 = vpop.permute.xlu0 %405 }
 0x599   :  { %1337 = vmatmul.msk.f32.vlgmr.msra.gmra.mxu3 %vm182_vm2, %v406_v41 }
 0x61c   :  { %v426_v40 = vpop.f32.mrf.mxu3 }
 0x61d   :  { %v430_v42 = vrot.slane %v426_v40, 6  ;;  %v431_v43 = vrot.slane %v426_v40, 7 }
 0x61f   :  { %v434_v44 = vadd.f32 %v430_v42, %v1698_v63  ;;  %v435_v45 = vadd.f32 %v431_v43, %v1695_v61 }
 0x621   :  { %1421 = vtanh.f32 %v434_v44  ;;  %v1338_v48 = vmul.f32 -1.442695, %v434_v44  ;;  %v1339_v52 = vmul.f32 -1.442695, %v435_v45 }
 0x622   :  { %1423 = vtanh.f32 %v435_v45 }
 0x623   :  { %1425 = vpow2.f32 %v1338_v48 }
 0x627   :  { %v1422_v46 = vpop.eup %1421 }
 0x628   :  { %v1424_v47 = vpop.eup %1423  ;;  %486 = vrot.lane.b32.xlu2 %v1422_v46, %s1638_s0 }
 0x629   :  { %488 = vrot.lane.b32.xlu1 %v1424_v47, %s1638_s0  ;;  %v1426_v49 = vpop.eup %1425 }
 0x62a   :  { %v442_v50 = vadd.f32 1.0, %v1426_v49 }
 0x62c   :  { %1427 = vrcp.f32 %v442_v50  ;;  %v455_v59 = vand.u32 2147483648, %v442_v50  ;;  %vm449_vm12 = vweird.f32 %v442_v50  ;;  %v453_v60 = vand.u32 2147483647, %v442_v50 }
 0x62d   :  { %1429 = vpow2.f32 %v1339_v52 }
 0x62e   :  { %v456_v0 = vor.u32 1.1754944e-38, %v455_v59  ;;  %vm454_vm14 = vcmp.eq.f32.partialorder %v453_v60, 8.507059e+37 }
 0x632   :  { %v1428_v51 = vpop.eup %1427 }
 0x633   :  { %v445_v53 = vmul.f32 %v1428_v51, %v442_v50  ;;  %v1430_v56 = vpop.eup %1429  ;;  %vm450_vm11 = vweird.f32 %v1428_v51 }
 0x634   :  { %v443_v57 = vadd.f32 1.0, %v1430_v56  ;;  %vm451_vm13 = vmor %vm449_vm12, %vm450_vm11 }
 0x635   :  { %v446_v54 = vsub.f32 1.0, %v445_v53 }
 0x636   :  { %1431 = vrcp.f32 %v443_v57  ;;  %v470_v9 = vand.u32 2147483648, %v443_v57  ;;  %vm464_vm3 = vweird.f32 %v443_v57  ;;  %v468_v11 = vand.u32 2147483647, %v443_v57 }
 0x637   :  { %v447_v55 = vmul.f32 %v1428_v51, %v446_v54 }
 0x638   :  { %v471_v13 = vor.u32 1.1754944e-38, %v470_v9  ;;  %vm469_vm5 = vcmp.eq.f32.partialorder %v468_v11, 8.507059e+37 }
 0x639   :  { %v448_v58 = vadd.f32 %v1428_v51, %v447_v55 }
 0x63b   :  { %v452_v62 = vsel %vm451_vm13, %v1428_v51, %v448_v58 }
 0x63c   :  { %v457_v2 = vsel %vm454_vm14, %v456_v0, %v452_v62  ;;  %v1432_v4 = vpop.eup %1431 }
 0x63d   :  { %v460_v5 = vmul.f32 %v1432_v4, %v443_v57  ;;  %vm465_vm15 = vweird.f32 %v1432_v4  ;;  %v482_v19 = vmul.f32 %v478_v17, %v457_v2 }
 0x63e   :  { %vm466_vm4 = vmor %vm464_vm3, %vm465_vm15 }
 0x63f   :  { %v461_v6 = vsub.f32 1.0, %v460_v5 }
 0x641   :  { %v462_v7 = vmul.f32 %v1432_v4, %v461_v6 }
 0x643   :  { %v463_v8 = vadd.f32 %v1432_v4, %v462_v7 }
 0x645   :  { %v467_v12 = vsel %vm466_vm4, %v1432_v4, %v463_v8 }
 0x646   :  { %v472_v15 = vsel %vm469_vm5, %v471_v13, %v467_v12 }
 0x647   :  { %v483_v20 = vmul.f32 %v479_v18, %v472_v15 }
 0x682   :  { %v487_v1 = vpop.permute.xlu2 %486 }
 0x683   :  { %v492_v3 = vmul.f32 %v487_v1, %v457_v2 }
 0x685   :  { %496 = vrot.lane.b32.xlu0 %v492_v3, %s1638_s0 }
 0x69b   :  { %v489_v14 = vpop.permute.xlu1 %488 }
 0x69c   :  { %v493_v16 = vmul.f32 %v489_v14, %v472_v15 }
 0x69e   :  { %498 = vrot.lane.b32.xlu2 %v493_v16, %s1638_s0 }
 0x6f7   :  { %v497_v21 = vpop.permute.xlu0 %496 }
 0x6f8   :  { %v499_v22 = vpop.permute.xlu2 %498  ;;  %v1743_v23 = vadd.f32 %v497_v21, %v482_v19 }
 0x6f9   :  { %v1745_v24 = vadd.f32 %v499_v22, %v483_v20 }
 0x6fa   :  { %1433 = vtanh.f32 %v1743_v23  ;;  %v594_v11 = vrot.slane %v1743_v23, 7 }
 0x6fb   :  { %1435 = vtanh.f32 %v1745_v24  ;;  %v595_v16 = vrot.slane %v1745_v24, 7 }
 0x700   :  { %v1434_v25 = vpop.eup %1433 }
 0x701   :  { %v1436_v26 = vpop.eup %1435  ;;  %508 = vrot.lane.b32.xlu1 %v1434_v25, %s1638_s0 }
 0x702   :  { %510 = vrot.lane.b32.xlu0 %v1436_v26, %s1638_s0 }
 0x773   :  { %v509_v28 = vpop.permute.xlu1 %508 }
 0x774   :  { %v511_v27 = vpop.permute.xlu0 %510  ;;  %v514_v29 = vmul.f32 %v509_v28, %v457_v2 }
 0x775   :  { %v515_v30 = vmul.f32 %v511_v27, %v472_v15 }
 0x776   :  { %v518_v31 = vrot.slane %v514_v29, 2 }
 0x777   :  { %v519_v32 = vrot.slane %v515_v30, 1 }
 0x779   :  { %v520_v33 = vsel %vm289_vm1, %v519_v32, %v518_v31 }
 0x77a   :  { %521 = vrot.lane.b32.xlu2 %v520_v33, %s1639_s2 }
 0x7d4   :  { %v522_v34 = vpop.permute.xlu2 %521 }
 0x7d5   :  { %1340 = vmatmul.msk.f32.vlgmr.msrb.gmra.mxu1 %vm182_vm2, %v522_v34 }
 0x852   :  { %v542_v35 = vpop.f32.mrf.mxu1 }
 0x853   :  { %v546_v36 = vrot.slane %v542_v35, 5  ;;  %v547_v37 = vrot.slane %v542_v35, 6 }
 0x855   :  { %v550_v38 = vadd.f32 %v546_v36, %v1698_v63  ;;  %v551_v39 = vadd.f32 %v547_v37, %v1695_v61 }
 0x857   :  { %1437 = vtanh.f32 %v550_v38  ;;  %v1341_v42 = vmul.f32 -1.442695, %v550_v38  ;;  %v1342_v43 = vmul.f32 -1.442695, %v551_v39 }
 0x858   :  { %1439 = vtanh.f32 %v551_v39 }
 0x859   :  { %1441 = vpow2.f32 %v1341_v42 }
 0x85a   :  { %1443 = vpow2.f32 %v1342_v43 }
 0x85d   :  { %v1438_v41 = vpop.eup %1437 }
 0x85e   :  { %v1440_v40 = vpop.eup %1439  ;;  %602 = vrot.lane.b32.xlu1 %v1438_v41, %s1638_s0 }
 0x85f   :  { %604 = vrot.lane.b32.xlu0 %v1440_v40, %s1638_s0  ;;  %v1442_v44 = vpop.eup %1441 }
 0x860   :  { %v1444_v45 = vpop.eup %1443  ;;  %v558_v46 = vadd.f32 1.0, %v1442_v44 }
 0x861   :  { %v559_v47 = vadd.f32 1.0, %v1444_v45 }
 0x862   :  { %1445 = vrcp.f32 %v558_v46  ;;  %v571_v58 = vand.u32 2147483648, %v558_v46  ;;  %vm565_vm8 = vweird.f32 %v558_v46  ;;  %v569_v60 = vand.u32 2147483647, %v558_v46 }
 0x863   :  { %1447 = vrcp.f32 %v559_v47  ;;  %v586_v59 = vand.u32 2147483648, %v559_v47  ;;  %vm580_vm9 = vweird.f32 %v559_v47  ;;  %v584_v62 = vand.u32 2147483647, %v559_v47 }
 0x864   :  { %v572_v2 = vor.u32 1.1754944e-38, %v571_v58  ;;  %vm570_vm12 = vcmp.eq.f32.partialorder %v569_v60, 8.507059e+37 }
 0x865   :  { %v587_v3 = vor.u32 1.1754944e-38, %v586_v59  ;;  %vm585_vm13 = vcmp.eq.f32.partialorder %v584_v62, 8.507059e+37 }
 0x868   :  { %v1446_v48 = vpop.eup %1445 }
 0x869   :  { %v1448_v49 = vpop.eup %1447  ;;  %v561_v50 = vmul.f32 %v1446_v48, %v558_v46  ;;  %vm566_vm6 = vweird.f32 %v1446_v48 }
 0x86a   :  { %v576_v51 = vmul.f32 %v1448_v49, %v559_v47  ;;  %vm581_vm7 = vweird.f32 %v1448_v49  ;;  %vm567_vm10 = vmor %vm565_vm8, %vm566_vm6 }
 0x86b   :  { %v562_v52 = vsub.f32 1.0, %v561_v50  ;;  %vm582_vm11 = vmor %vm580_vm9, %vm581_vm7 }
 0x86c   :  { %v577_v53 = vsub.f32 1.0, %v576_v51 }
 0x86d   :  { %v563_v54 = vmul.f32 %v1446_v48, %v562_v52 }
 0x86e   :  { %v578_v55 = vmul.f32 %v1448_v49, %v577_v53 }
 0x86f   :  { %v564_v56 = vadd.f32 %v1446_v48, %v563_v54 }
 0x870   :  { %v579_v57 = vadd.f32 %v1448_v49, %v578_v55 }
 0x871   :  { %v568_v0 = vsel %vm567_vm10, %v1446_v48, %v564_v56 }
 0x872   :  { %v583_v1 = vsel %vm582_vm11, %v1448_v49, %v579_v57  ;;  %v573_v5 = vsel %vm570_vm12, %v572_v2, %v568_v0 }
 0x873   :  { %v588_v7 = vsel %vm585_vm13, %v587_v3, %v583_v1  ;;  %v598_v12 = vmul.f32 %v594_v11, %v573_v5 }
 0x874   :  { %v599_v17 = vmul.f32 %v595_v16, %v588_v7 }
 0x8d0   :  { %v603_v4 = vpop.permute.xlu1 %602 }
 0x8d1   :  { %v605_v6 = vpop.permute.xlu0 %604  ;;  %v608_v8 = vmul.f32 %v603_v4, %v573_v5 }
 0x8d2   :  { %v609_v9 = vmul.f32 %v605_v6, %v588_v7 }
 0x8d3   :  { %612 = vrot.lane.b32.xlu2 %v608_v8, %s1638_s0 }
 0x8d4   :  { %614 = vrot.lane.b32.xlu1 %v609_v9, %s1638_s0 }
 0x92d   :  { %v613_v13 = vpop.permute.xlu2 %612 }
 0x92e   :  { %v1761_v14 = vadd.f32 %v613_v13, %v598_v12 }
 0x930   :  { %1449 = vtanh.f32 %v1761_v14  ;;  %v710_v9 = vrot.slane %v1761_v14, 7 }
 0x936   :  { %v1450_v15 = vpop.eup %1449 }
 0x937   :  { %624 = vrot.lane.b32.xlu0 %v1450_v15, %s1638_s0 }
 0x946   :  { %v615_v18 = vpop.permute.xlu1 %614 }
 0x947   :  { %v1766_v19 = vadd.f32 %v615_v18, %v599_v17 }
 0x949   :  { %1451 = vtanh.f32 %v1766_v19  ;;  %v711_v4 = vrot.slane %v1766_v19, 7 }
 0x94f   :  { %v1452_v20 = vpop.eup %1451 }
 0x950   :  { %626 = vrot.lane.b32.xlu2 %v1452_v20, %s1638_s0 }
 0x9a9   :  { %v625_v21 = vpop.permute.xlu0 %624 }
 0x9aa   :  { %v627_v22 = vpop.permute.xlu2 %626  ;;  %v630_v23 = vmul.f32 %v625_v21, %v573_v5 }
 0x9ab   :  { %v631_v25 = vmul.f32 %v627_v22, %v588_v7 }
 0x9ac   :  { %v634_v26 = vrot.slane %v630_v23, 3 }
 0x9ad   :  { %v635_v28 = vrot.slane %v631_v25, 2 }
 0x9af   :  { %v636_v27 = vsel %vm289_vm1, %v635_v28, %v634_v26 }
 0x9b0   :  { %637 = vrot.lane.b32.xlu1 %v636_v27, %s1639_s2 }
 0xa22   :  { %v638_v24 = vpop.permute.xlu1 %637 }
 0xa23   :  { %1343 = vmatmul.msk.f32.vlgmr.msrb.gmra.mxu2 %vm182_vm2, %v638_v24 }
 0xaa6   :  { %v658_v29 = vpop.f32.mrf.mxu2 }
 0xaa7   :  { %v662_v30 = vrot.slane %v658_v29, 4  ;;  %v663_v31 = vrot.slane %v658_v29, 5 }
 0xaa9   :  { %v666_v32 = vadd.f32 %v662_v30, %v1698_v63  ;;  %v667_v33 = vadd.f32 %v663_v31, %v1695_v61 }
 0xaab   :  { %1453 = vtanh.f32 %v666_v32  ;;  %v1345_v36 = vmul.f32 -1.442695, %v667_v33  ;;  %v1344_v41 = vmul.f32 -1.442695, %v666_v32 }
 0xaac   :  { %1455 = vtanh.f32 %v667_v33 }
 0xaad   :  { %1457 = vpow2.f32 %v1345_v36 }
 0xab1   :  { %v1454_v34 = vpop.eup %1453 }
 0xab2   :  { %v1456_v35 = vpop.eup %1455  ;;  %718 = vrot.lane.b32.xlu0 %v1454_v34, %s1638_s0 }
 0xab3   :  { %720 = vrot.lane.b32.xlu2 %v1456_v35, %s1638_s0  ;;  %v1458_v37 = vpop.eup %1457 }
 0xab4   :  { %v675_v38 = vadd.f32 1.0, %v1458_v37 }
 0xab6   :  { %1459 = vrcp.f32 %v675_v38  ;;  %v702_v47 = vand.u32 2147483648, %v675_v38  ;;  %vm696_vm15 = vweird.f32 %v675_v38  ;;  %v700_v48 = vand.u32 2147483647, %v675_v38 }
 0xab7   :  { %1461 = vpow2.f32 %v1344_v41 }
 0xab8   :  { %v703_v50 = vor.u32 1.1754944e-38, %v702_v47  ;;  %vm701_vm4 = vcmp.eq.f32.partialorder %v700_v48, 8.507059e+37 }
 0xabc   :  { %v1460_v39 = vpop.eup %1459 }
 0xabd   :  { %v692_v40 = vmul.f32 %v1460_v39, %v675_v38  ;;  %v1462_v43 = vpop.eup %1461  ;;  %vm697_vm14 = vweird.f32 %v1460_v39 }
 0xabe   :  { %v674_v45 = vadd.f32 1.0, %v1462_v43  ;;  %vm698_vm3 = vmor %vm696_vm15, %vm697_vm14 }
 0xabf   :  { %v693_v42 = vsub.f32 1.0, %v692_v40 }
 0xac0   :  { %1463 = vrcp.f32 %v674_v45  ;;  %v687_v59 = vand.u32 2147483648, %v674_v45  ;;  %vm681_vm6 = vweird.f32 %v674_v45  ;;  %v685_v60 = vand.u32 2147483647, %v674_v45 }
 0xac1   :  { %v694_v44 = vmul.f32 %v1460_v39, %v693_v42 }
 0xac2   :  { %v688_v0 = vor.u32 1.1754944e-38, %v687_v59  ;;  %vm686_vm8 = vcmp.eq.f32.partialorder %v685_v60, 8.507059e+37 }
 0xac3   :  { %v695_v46 = vadd.f32 %v1460_v39, %v694_v44 }
 0xac5   :  { %v699_v49 = vsel %vm698_vm3, %v1460_v39, %v695_v46 }
 0xac6   :  { %v704_v52 = vsel %vm701_vm4, %v703_v50, %v699_v49  ;;  %v1464_v53 = vpop.eup %1463 }
 0xac7   :  { %v677_v55 = vmul.f32 %v1464_v53, %v674_v45  ;;  %vm682_vm5 = vweird.f32 %v1464_v53  ;;  %v715_v5 = vmul.f32 %v711_v4, %v704_v52 }
 0xac8   :  { %vm683_vm7 = vmor %vm681_vm6, %vm682_vm5 }
 0xac9   :  { %v678_v56 = vsub.f32 1.0, %v677_v55 }
 0xacb   :  { %v679_v57 = vmul.f32 %v1464_v53, %v678_v56 }
 0xacd   :  { %v680_v58 = vadd.f32 %v1464_v53, %v679_v57 }
 0xacf   :  { %v684_v62 = vsel %vm683_vm7, %v1464_v53, %v680_v58 }
 0xad0   :  { %v689_v2 = vsel %vm686_vm8, %v688_v0, %v684_v62 }
 0xad1   :  { %v714_v11 = vmul.f32 %v710_v9, %v689_v2 }
 0xb0d   :  { %v721_v51 = vpop.permute.xlu2 %720 }
 0xb0e   :  { %v725_v54 = vmul.f32 %v721_v51, %v704_v52 }
 0xb10   :  { %730 = vrot.lane.b32.xlu0 %v725_v54, %s1638_s0 }
 0xb24   :  { %v719_v1 = vpop.permute.xlu0 %718 }
 0xb25   :  { %v724_v3 = vmul.f32 %v719_v1, %v689_v2 }
 0xb27   :  { %728 = vrot.lane.b32.xlu1 %v724_v3, %s1638_s0 }
 0xb82   :  { %v731_v6 = vpop.permute.xlu0 %730 }
 0xb83   :  { %v1780_v7 = vadd.f32 %v731_v6, %v715_v5 }
 0xb85   :  { %1465 = vtanh.f32 %v1780_v7  ;;  %v827_v62 = vrot.slane %v1780_v7, 7 }
 0xb8b   :  { %v1466_v8 = vpop.eup %1465 }
 0xb8c   :  { %742 = vrot.lane.b32.xlu1 %v1466_v8, %s1638_s0 }
 0xb99   :  { %v729_v12 = vpop.permute.xlu1 %728 }
 0xb9a   :  { %v1785_v13 = vadd.f32 %v729_v12, %v714_v11 }
 0xb9c   :  { %1467 = vtanh.f32 %v1785_v13  ;;  %v826_v60 = vrot.slane %v1785_v13, 7 }
 0xba2   :  { %v1468_v15 = vpop.eup %1467 }
 0xba3   :  { %740 = vrot.lane.b32.xlu2 %v1468_v15, %s1638_s0 }
 0xbfd   :  { %v741_v16 = vpop.permute.xlu2 %740 }
 0xbfe   :  { %v743_v17 = vpop.permute.xlu1 %742  ;;  %v746_v18 = vmul.f32 %v741_v16, %v689_v2 }
 0xbff   :  { %v747_v19 = vmul.f32 %v743_v17, %v704_v52 }
 0xc00   :  { %v750_v20 = vrot.slane %v746_v18, 4 }
 0xc01   :  { %v751_v21 = vrot.slane %v747_v19, 3 }
 0xc03   :  { %v752_v22 = vsel %vm289_vm1, %v751_v21, %v750_v20 }
 0xc04   :  { %753 = vrot.lane.b32.xlu0 %v752_v22, %s1639_s2 }
 0xc76   :  { %v754_v14 = vpop.permute.xlu0 %753 }
 0xc77   :  { %1346 = vmatmul.msk.f32.vlgmr.msrb.gmra.mxu3 %vm182_vm2, %v754_v14 }
 0xcfa   :  { %v774_v23 = vpop.f32.mrf.mxu3 }
 0xcfb   :  { %v778_v25 = vrot.slane %v774_v23, 3  ;;  %v779_v26 = vrot.slane %v774_v23, 4 }
 0xcfd   :  { %v782_v28 = vadd.f32 %v778_v25, %v1698_v63  ;;  %v783_v27 = vadd.f32 %v779_v26, %v1695_v61 }
 0xcff   :  { %1469 = vtanh.f32 %v782_v28  ;;  %v1347_v30 = vmul.f32 -1.442695, %v782_v28  ;;  %v1348_v34 = vmul.f32 -1.442695, %v783_v27 }
 0xd00   :  { %1471 = vtanh.f32 %v783_v27 }
 0xd01   :  { %1473 = vpow2.f32 %v1347_v30 }
 0xd05   :  { %v1470_v24 = vpop.eup %1469 }
 0xd06   :  { %v1472_v29 = vpop.eup %1471  ;;  %834 = vrot.lane.b32.xlu2 %v1470_v24, %s1638_s0 }
 0xd07   :  { %836 = vrot.lane.b32.xlu1 %v1472_v29, %s1638_s0  ;;  %v1474_v31 = vpop.eup %1473 }
 0xd08   :  { %v790_v32 = vadd.f32 1.0, %v1474_v31 }
 0xd0a   :  { %1475 = vrcp.f32 %v790_v32  ;;  %v803_v40 = vand.u32 2147483648, %v790_v32  ;;  %vm797_vm10 = vweird.f32 %v790_v32  ;;  %v801_v42 = vand.u32 2147483647, %v790_v32 }
 0xd0b   :  { %1477 = vpow2.f32 %v1348_v34 }
 0xd0c   :  { %v804_v44 = vor.u32 1.1754944e-38, %v803_v40  ;;  %vm802_vm12 = vcmp.eq.f32.partialorder %v801_v42, 8.507059e+37 }
 0xd10   :  { %v1476_v33 = vpop.eup %1475 }
 0xd11   :  { %v793_v35 = vmul.f32 %v1476_v33, %v790_v32  ;;  %v1478_v38 = vpop.eup %1477  ;;  %vm798_vm9 = vweird.f32 %v1476_v33 }
 0xd12   :  { %v791_v39 = vadd.f32 1.0, %v1478_v38  ;;  %vm799_vm11 = vmor %vm797_vm10, %vm798_vm9 }
 0xd13   :  { %v794_v36 = vsub.f32 1.0, %v793_v35 }
 0xd14   :  { %1479 = vrcp.f32 %v791_v39  ;;  %v818_v53 = vand.u32 2147483648, %v791_v39  ;;  %vm812_vm14 = vweird.f32 %v791_v39  ;;  %v816_v54 = vand.u32 2147483647, %v791_v39 }
 0xd15   :  { %v795_v37 = vmul.f32 %v1476_v33, %v794_v36 }
 0xd16   :  { %v819_v56 = vor.u32 1.1754944e-38, %v818_v53  ;;  %vm817_vm3 = vcmp.eq.f32.partialorder %v816_v54, 8.507059e+37 }
 0xd17   :  { %v796_v41 = vadd.f32 %v1476_v33, %v795_v37 }
 0xd19   :  { %v800_v43 = vsel %vm799_vm11, %v1476_v33, %v796_v41 }
 0xd1a   :  { %v805_v46 = vsel %vm802_vm12, %v804_v44, %v800_v43  ;;  %v1480_v48 = vpop.eup %1479 }
 0xd1b   :  { %v808_v49 = vmul.f32 %v1480_v48, %v791_v39  ;;  %vm813_vm13 = vweird.f32 %v1480_v48  ;;  %v830_v0 = vmul.f32 %v826_v60, %v805_v46 }
 0xd1c   :  { %vm814_vm15 = vmor %vm812_vm14, %vm813_vm13 }
 0xd1d   :  { %v809_v50 = vsub.f32 1.0, %v808_v49 }
 0xd1f   :  { %v810_v51 = vmul.f32 %v1480_v48, %v809_v50 }
 0xd21   :  { %v811_v52 = vadd.f32 %v1480_v48, %v810_v51 }
 0xd23   :  { %v815_v55 = vsel %vm814_vm15, %v1480_v48, %v811_v52 }
 0xd24   :  { %v820_v58 = vsel %vm817_vm3, %v819_v56, %v815_v55 }
 0xd25   :  { %v831_v1 = vmul.f32 %v827_v62, %v820_v58 }
 0xd60   :  { %v835_v45 = vpop.permute.xlu2 %834 }
 0xd61   :  { %v840_v47 = vmul.f32 %v835_v45, %v805_v46 }
 0xd63   :  { %844 = vrot.lane.b32.xlu0 %v840_v47, %s1638_s0 }
 0xd79   :  { %v837_v57 = vpop.permute.xlu1 %836 }
 0xd7a   :  { %v841_v59 = vmul.f32 %v837_v57, %v820_v58 }
 0xd7c   :  { %846 = vrot.lane.b32.xlu2 %v841_v59, %s1638_s0 }
 0xdd5   :  { %v845_v2 = vpop.permute.xlu0 %844 }
 0xdd6   :  { %v847_v3 = vpop.permute.xlu2 %846  ;;  %v1800_v4 = vadd.f32 %v845_v2, %v830_v0 }
 0xdd7   :  { %v1802_v5 = vadd.f32 %v847_v3, %v831_v1 }
 0xdd8   :  { %1481 = vtanh.f32 %v1800_v4  ;;  %v942_v54 = vrot.slane %v1800_v4, 7 }
 0xdd9   :  { %1483 = vtanh.f32 %v1802_v5  ;;  %v943_v59 = vrot.slane %v1802_v5, 7 }
 0xdde   :  { %v1482_v6 = vpop.eup %1481 }
 0xddf   :  { %v1484_v8 = vpop.eup %1483  ;;  %856 = vrot.lane.b32.xlu1 %v1482_v6, %s1638_s0 }
 0xde0   :  { %858 = vrot.lane.b32.xlu0 %v1484_v8, %s1638_s0 }
 0xe51   :  { %v857_v9 = vpop.permute.xlu1 %856 }
 0xe52   :  { %v859_v7 = vpop.permute.xlu0 %858  ;;  %v862_v11 = vmul.f32 %v857_v9, %v805_v46 }
 0xe53   :  { %v863_v12 = vmul.f32 %v859_v7, %v820_v58 }
 0xe54   :  { %v866_v13 = vrot.slane %v862_v11, 5 }
 0xe55   :  { %v867_v15 = vrot.slane %v863_v12, 4 }
 0xe57   :  { %v868_v16 = vsel %vm289_vm1, %v867_v15, %v866_v13 }
 0xe58   :  { %869 = vrot.lane.b32.xlu2 %v868_v16, %s1639_s2 }
 0xeb2   :  { %v870_v17 = vpop.permute.xlu2 %869 }
 0xeb3   :  { %1349 = vmatmul.msk.f32.vlgmr.msrb.gmra.mxu0 %vm182_vm2, %v870_v17 }
 0xf30   :  { %v890_v18 = vpop.f32.mrf.mxu0 }
 0xf31   :  { %v894_v19 = vrot.slane %v890_v18, 2  ;;  %v895_v20 = vrot.slane %v890_v18, 3 }
 0xf33   :  { %v898_v21 = vadd.f32 %v894_v19, %v1698_v63  ;;  %v899_v22 = vadd.f32 %v895_v20, %v1695_v61 }
 0xf35   :  { %1485 = vtanh.f32 %v898_v21  ;;  %v1350_v25 = vmul.f32 -1.442695, %v898_v21  ;;  %v1351_v26 = vmul.f32 -1.442695, %v899_v22 }
 0xf36   :  { %1487 = vtanh.f32 %v899_v22 }
 0xf37   :  { %1489 = vpow2.f32 %v1350_v25 }
 0xf38   :  { %1491 = vpow2.f32 %v1351_v26 }
 0xf3b   :  { %v1486_v14 = vpop.eup %1485 }
 0xf3c   :  { %v1488_v23 = vpop.eup %1487  ;;  %950 = vrot.lane.b32.xlu1 %v1486_v14, %s1638_s0 }
 0xf3d   :  { %952 = vrot.lane.b32.xlu0 %v1488_v23, %s1638_s0  ;;  %v1490_v28 = vpop.eup %1489 }
 0xf3e   :  { %v1492_v27 = vpop.eup %1491  ;;  %v906_v24 = vadd.f32 1.0, %v1490_v28 }
 0xf3f   :  { %v907_v29 = vadd.f32 1.0, %v1492_v27 }
 0xf40   :  { %1493 = vrcp.f32 %v906_v24  ;;  %v919_v41 = vand.u32 2147483648, %v906_v24  ;;  %vm913_vm6 = vweird.f32 %v906_v24  ;;  %v917_v42 = vand.u32 2147483647, %v906_v24 }
 0xf41   :  { %1495 = vrcp.f32 %v907_v29  ;;  %v934_v40 = vand.u32 2147483648, %v907_v29  ;;  %vm928_vm7 = vweird.f32 %v907_v29  ;;  %v932_v43 = vand.u32 2147483647, %v907_v29 }
 0xf42   :  { %v920_v46 = vor.u32 1.1754944e-38, %v919_v41  ;;  %vm918_vm10 = vcmp.eq.f32.partialorder %v917_v42, 8.507059e+37 }
 0xf43   :  { %v935_v47 = vor.u32 1.1754944e-38, %v934_v40  ;;  %vm933_vm11 = vcmp.eq.f32.partialorder %v932_v43, 8.507059e+37 }
 0xf46   :  { %v1494_v30 = vpop.eup %1493 }
 0xf47   :  { %v1496_v31 = vpop.eup %1495  ;;  %v909_v32 = vmul.f32 %v1494_v30, %v906_v24  ;;  %vm914_vm4 = vweird.f32 %v1494_v30 }
 0xf48   :  { %v924_v33 = vmul.f32 %v1496_v31, %v907_v29  ;;  %vm929_vm5 = vweird.f32 %v1496_v31  ;;  %vm915_vm8 = vmor %vm913_vm6, %vm914_vm4 }
 0xf49   :  { %v910_v34 = vsub.f32 1.0, %v909_v32  ;;  %vm930_vm9 = vmor %vm928_vm7, %vm929_vm5  ;;  %vm1127_vm7 = vcmask 254976  }
 0xf4a   :  { %v925_v35 = vsub.f32 1.0, %v924_v33 }
 0xf4b   :  { %v911_v36 = vmul.f32 %v1494_v30, %v910_v34 }
 0xf4c   :  { %v926_v37 = vmul.f32 %v1496_v31, %v925_v35 }
 0xf4d   :  { %v912_v38 = vadd.f32 %v1494_v30, %v911_v36 }
 0xf4e   :  { %v927_v39 = vadd.f32 %v1496_v31, %v926_v37 }
 0xf4f   :  { %v916_v44 = vsel %vm915_vm8, %v1494_v30, %v912_v38 }
 0xf50   :  { %v931_v45 = vsel %vm930_vm9, %v1496_v31, %v927_v39  ;;  %v921_v49 = vsel %vm918_vm10, %v920_v46, %v916_v44 }
 0xf51   :  { %v936_v51 = vsel %vm933_vm11, %v935_v47, %v931_v45  ;;  %v946_v55 = vmul.f32 %v942_v54, %v921_v49  ;;  %vm1186_vm11 = vcmask 123904  }
 0xf52   :  { %v947_v60 = vmul.f32 %v943_v59, %v936_v51  ;;  %v69_v59 = vld [vmem:[#allocation5 + $0x38] sm:$0xff] }
 0xfae   :  { %v951_v48 = vpop.permute.xlu1 %950 }
 0xfaf   :  { %v953_v50 = vpop.permute.xlu0 %952  ;;  %v956_v52 = vmul.f32 %v951_v48, %v921_v49 }
 0xfb0   :  { %v957_v53 = vmul.f32 %v953_v50, %v936_v51 }
 0xfb1   :  { %960 = vrot.lane.b32.xlu2 %v956_v52, %s1638_s0 }
 0xfb2   :  { %962 = vrot.lane.b32.xlu1 %v957_v53, %s1638_s0 }
0x100b   :  { %v961_v56 = vpop.permute.xlu2 %960 }
0x100c   :  { %v1818_v57 = vadd.f32 %v961_v56, %v946_v55  ;;  %v71_v56 = vld [vmem:[#allocation5 + $0x48] sm:$0xff] }
0x100d   :  { %1118 = vmatpush.msra.mxu2 %v71_v56 }
0x100e   :  { %1497 = vtanh.f32 %v1818_v57 }
0x1014   :  { %v1498_v58 = vpop.eup %1497 }
0x1015   :  { %972 = vrot.lane.b32.xlu0 %v1498_v58, %s1638_s0  ;;  %v70_v58 = vld [vmem:[#allocation5 + $0x40] sm:$0xff] }
0x1016   :  { %1119 = vmatpush.msra.mxu2 %v70_v58  ;;  %v1379_v58 = vld [vmem:[#allocation7 + $0x9] ss:$0 sm:$0xff] }
0x1018   :  { %1120 = vmatpush.msra.mxu2 %v69_v59 }
0x1024   :  { %v963_v62 = vpop.permute.xlu1 %962 }
0x1025   :  { %v1823_v0 = vadd.f32 %v963_v62, %v947_v60  ;;  %v68_v60 = vld [vmem:[#allocation5 + $0x30] sm:$0xff] }
0x1026   :  { %1121 = vmatpush.msra.mxu2 %v68_v60 }
0x1027   :  { %1499 = vtanh.f32 %v1823_v0  ;;  %v1059_v46 = vrot.slane %v1823_v0, 7 }
0x102d   :  { %v1500_v1 = vpop.eup %1499 }
0x102e   :  { %974 = vrot.lane.b32.xlu2 %v1500_v1, %s1638_s0 }
0x1087   :  { %v973_v2 = vpop.permute.xlu0 %972 }
0x1088   :  { %v975_v3 = vpop.permute.xlu2 %974  ;;  %v978_v4 = vmul.f32 %v973_v2, %v921_v49 }
0x1089   :  { %v979_v6 = vmul.f32 %v975_v3, %v936_v51  ;;  %v1058_v51 = vrot.slane %v1818_v57, 7 }
0x108a   :  { %v982_v8 = vrot.slane %v978_v4, 6 }
0x108b   :  { %v983_v9 = vrot.slane %v979_v6, 5 }
0x108d   :  { %v984_v7 = vsel %vm289_vm1, %v983_v9, %v982_v8  ;;  %v1374_v8 = vld [vmem:[#allocation7 + $0x3] ss:$0 sm:$0xff] }
0x108e   :  { %985 = vrot.lane.b32.xlu1 %v984_v7, %s1639_s2 }
0x1100   :  { %v986_v5 = vpop.permute.xlu1 %985 }
0x1101   :  { %1352 = vmatmul.msk.f32.vlgmr.msra.gmra.mxu1 %vm182_vm2, %v986_v5 }
0x117e   :  { %v1006_v11 = vpop.f32.mrf.mxu1 }
0x117f   :  { %v1010_v12 = vrot.slane %v1006_v11, 1  ;;  %v1011_v13 = vrot.slane %v1006_v11, 2 }
0x1181   :  { %v1014_v15 = vadd.f32 %v1010_v12, %v1698_v63  ;;  %v1015_v16 = vadd.f32 %v1011_v13, %v1695_v61  ;;  %v1640_v12 = vmov 32.0  }
0x1183   :  { %1501 = vtanh.f32 %v1014_v15  ;;  %v1354_v19 = vmul.f32 -1.442695, %v1015_v16  ;;  %v1353_v14 = vmul.f32 -1.442695, %v1014_v15 }
0x1184   :  { %1503 = vtanh.f32 %v1015_v16 }
0x1185   :  { %1505 = vpow2.f32 %v1354_v19 }
0x1189   :  { %v1502_v17 = vpop.eup %1501 }
0x118a   :  { %v1504_v18 = vpop.eup %1503  ;;  %1066 = vrot.lane.b32.xlu0 %v1502_v17, %s1638_s0 }
0x118b   :  { %1068 = vrot.lane.b32.xlu2 %v1504_v18, %s1638_s0  ;;  %v1506_v20 = vpop.eup %1505 }
0x118c   :  { %v1023_v21 = vadd.f32 1.0, %v1506_v20 }
0x118e   :  { %1507 = vrcp.f32 %v1023_v21  ;;  %v1050_v27 = vand.u32 2147483648, %v1023_v21  ;;  %vm1044_vm13 = vweird.f32 %v1023_v21  ;;  %v1048_v24 = vand.u32 2147483647, %v1023_v21 }
0x118f   :  { %1509 = vpow2.f32 %v1353_v14 }
0x1190   :  { %v1051_v30 = vor.u32 1.1754944e-38, %v1050_v27  ;;  %vm1049_vm15 = vcmp.eq.f32.partialorder %v1048_v24, 8.507059e+37 }
0x1194   :  { %v1508_v22 = vpop.eup %1507 }
0x1195   :  { %v1040_v23 = vmul.f32 %v1508_v22, %v1023_v21  ;;  %v1510_v25 = vpop.eup %1509  ;;  %vm1045_vm12 = vweird.f32 %v1508_v22 }
0x1196   :  { %v1022_v26 = vadd.f32 1.0, %v1510_v25  ;;  %vm1046_vm14 = vmor %vm1044_vm13, %vm1045_vm12  ;;  %v74_v25 = vld [vmem:[#allocation5 + $0x60] sm:$0xff] }
0x1197   :  { %v1041_v63 = vsub.f32 1.0, %v1040_v23 }
0x1198   :  { %1511 = vrcp.f32 %v1022_v26  ;;  %v1035_v39 = vand.u32 2147483648, %v1022_v26  ;;  %vm1029_vm4 = vweird.f32 %v1022_v26  ;;  %v1033_v41 = vand.u32 2147483647, %v1022_v26 }
0x1199   :  { %v1042_v61 = vmul.f32 %v1508_v22, %v1041_v63  ;;  %v75_v63 = vld [vmem:[#allocation5 + $0x68] sm:$0xff] }
0x119a   :  { %v1036_v42 = vor.u32 1.1754944e-38, %v1035_v39  ;;  %vm1034_vm6 = vcmp.eq.f32.partialorder %v1033_v41, 8.507059e+37  ;;  %1177 = vmatpush.msra.mxu3 %v75_v63 }
0x119b   :  { %v1043_v28 = vadd.f32 %v1508_v22, %v1042_v61  ;;  %v73_v61 = vld [vmem:[#allocation5 + $0x58] sm:$0xff] }
0x119c   :  { %1178 = vmatpush.msra.mxu3 %v74_v25 }
0x119d   :  { %v1047_v29 = vsel %vm1046_vm14, %v1508_v22, %v1043_v28 }
0x119e   :  { %v1052_v32 = vsel %vm1049_vm15, %v1051_v30, %v1047_v29  ;;  %v1512_v33 = vpop.eup %1511  ;;  %1179 = vmatpush.msra.mxu3 %v73_v61 }
0x119f   :  { %v1025_v35 = vmul.f32 %v1512_v33, %v1022_v26  ;;  %vm1030_vm3 = vweird.f32 %v1512_v33  ;;  %v1063_v47 = vmul.f32 %v1059_v46, %v1052_v32  ;;  %v72_v26 = vld [vmem:[#allocation5 + $0x50] sm:$0xff] }
0x11a0   :  { %vm1031_vm5 = vmor %vm1029_vm4, %vm1030_vm3  ;;  %1180 = vmatpush.msra.mxu3 %v72_v26  ;;  %v1381_v26 = vld [vmem:[#allocation7 + $0x8] ss:$0 sm:$0xff] }
0x11a1   :  { %v1026_v36 = vsub.f32 1.0, %v1025_v35  ;;  %v1375_v35 = vld [vmem:[#allocation7 + $0x4] ss:$0 sm:$0xff] }
0x11a3   :  { %v1027_v37 = vmul.f32 %v1512_v33, %v1026_v36 }
0x11a5   :  { %v1028_v38 = vadd.f32 %v1512_v33, %v1027_v37 }
0x11a7   :  { %v1032_v40 = vsel %vm1031_vm5, %v1512_v33, %v1028_v38  ;;  %v1376_v38 = vld [vmem:[#allocation7 + $0x5] ss:$0 sm:$0xff] }
0x11a8   :  { %v1037_v44 = vsel %vm1034_vm6, %v1036_v42, %v1032_v40  ;;  %v1377_v40 = vld [vmem:[#allocation7 + $0x6] ss:$0 sm:$0xff]  ;;  %vm1284_vm6 = vcmask 1041408  }
0x11a9   :  { %v1062_v52 = vmul.f32 %v1058_v51, %v1037_v44 }
0x11e5   :  { %v1069_v31 = vpop.permute.xlu2 %1068 }
0x11e6   :  { %v1073_v34 = vmul.f32 %v1069_v31, %v1052_v32 }
0x11e8   :  { %1078 = vrot.lane.b32.xlu0 %v1073_v34, %s1638_s0 }
0x11fc   :  { %v1067_v43 = vpop.permute.xlu0 %1066 }
0x11fd   :  { %v1072_v45 = vmul.f32 %v1067_v43, %v1037_v44 }
0x11ff   :  { %1076 = vrot.lane.b32.xlu1 %v1072_v45, %s1638_s0 }
0x125a   :  { %v1079_v48 = vpop.permute.xlu0 %1078 }
0x125b   :  { %v1083_v49 = vadd.f32 %v1079_v48, %v1063_v47 }
0x125d   :  { %1513 = vtanh.f32 %v1083_v49 }
0x1263   :  { %v1514_v50 = vpop.eup %1513 }
0x1264   :  { %1090 = vrot.lane.b32.xlu1 %v1514_v50, %s1638_s0 }
0x1271   :  { %v1077_v53 = vpop.permute.xlu1 %1076 }
0x1272   :  { %v1082_v54 = vadd.f32 %v1077_v53, %v1062_v52 }
0x1274   :  { %1515 = vtanh.f32 %v1082_v54 }
0x1275   :  { %1517 = vrcp.f32 %v1640_v12 }
0x127a   :  { %v1516_v55 = vpop.eup %1515 }
0x127b   :  { %1088 = vrot.lane.b32.xlu2 %v1516_v55, %s1638_s0  ;;  %v1518_v13 = vpop.eup %1517 }
0x127c   :  { %v1132_v15 = vmul.f32 32.0, %v1518_v13 }
0x127e   :  { %v1133_v16 = vsub.f32 1.0, %v1132_v15 }
0x1280   :  { %v1134_v17 = vmul.f32 %v1518_v13, %v1133_v16 }
0x1282   :  { %v1135_v18 = vadd.f32 %v1518_v13, %v1134_v17 }
0x12d5   :  { %v1089_v62 = vpop.permute.xlu2 %1088 }
0x12d6   :  { %v1091_v0 = vpop.permute.xlu1 %1090  ;;  %v1094_v1 = vmul.f32 %v1089_v62, %v1037_v44  ;;  %v1378_v62 = vld [vmem:[#allocation7 + $0xa] ss:$0 sm:$0xff] }
0x12d7   :  { %v1095_v2 = vmul.f32 %v1091_v0, %v1052_v32 }
0x12d8   :  { %v1099_v57 = vrot.slane %v1094_v1, 7 }
0x12d9   :  { %v1100_v3 = vrot.slane %v1095_v2, 6 }
0x12db   :  { %v1101_v4 = vsel %vm289_vm1, %v1100_v3, %v1099_v57  ;;  %vm1136_vm1 = vweird.f32 %v1518_v13  ;;  %v79_v57 = vld [vmem:[#allocation5 + $0x88] sm:$0xff]  ;;  %v78_v3 = vld [vmem:[#allocation5 + $0x80] sm:$0xff] }
0x12dc   :  { %1102 = vrot.lane.b32.xlu0 %v1101_v4, %s1639_s2  ;;  %v1137_v19 = vsel %vm1136_vm1, %v1518_v13, %v1135_v18  ;;  %1272 = vmatpush.msra.mxu0 %v79_v57 }
0x12de   :  { %1273 = vmatpush.msra.mxu0 %v78_v3 }
0x134e   :  { %v1103_v6 = vpop.permute.xlu0 %1102 }
0x134f   :  { %1355 = vmatmul.msk.f32.vlgmr.msra.gmra.mxu2 %vm182_vm2, %v1103_v6  ;;  %v77_v6 = vld [vmem:[#allocation5 + $0x78] sm:$0xff] }
0x1350   :  { %1274 = vmatpush.msra.mxu0 %v77_v6 }
0x13d2   :  { %v1123_v9 = vpop.f32.mrf.mxu2 }
0x13d3   :  { %v1124_v7 = vadd.f32 %v1374_v8, %v1123_v9  ;;  %v76_v9 = vld [vmem:[#allocation5 + $0x70] sm:$0xff] }
0x13d4   :  { %1275 = vmatpush.msra.mxu0 %v76_v9 }
0x13d5   :  { %v1126_v5 = vmax.f32 %v1124_v7, 0.0 }
0x13d7   :  { %v1128_v11 = vsel %vm1127_vm7, %v1126_v5, 0.0 }
0x13d8   :  { %1129 = vadd.xlane.f32.xlu2 %v1128_v11 }
0x144b   :  { %v1130_v20 = vpop.xlane.xlu2 %1129 }
0x144c   :  { %v1138_v21 = vmul.f32 %v1137_v19, %v1130_v20 }
0x144e   :  { %v1139_v22 = vsub.f32 %v1126_v5, %v1138_v21 }
0x1450   :  { %v1140_v14 = vmul.f32 %v1139_v22, %v1139_v22 }
0x1452   :  { %v1141_v23 = vsel %vm1127_vm7, %v1140_v14, 0.0 }
0x1453   :  { %1142 = vadd.xlane.f32.xlu1 %v1141_v23  ;;  %v1380_v23 = vld [vmem:[#allocation7 + $0x7] ss:$0 sm:$0xff] }
0x14c6   :  { %v1143_v28 = vpop.xlane.xlu1 %1142 }
0x14c7   :  { %v1144_v27 = vmul.f32 %v1143_v28, %v1137_v19 }
0x14c9   :  { %v1145_v24 = vadd.f32 1e-05, %v1144_v27 }
0x14cb   :  { %1519 = vrsqrt.f32 %v1145_v24  ;;  %vm1152_vm9 = vweird.f32 %v1145_v24 }
0x14d1   :  { %v1520_v29 = vpop.eup %1519 }
0x14d2   :  { %v1147_v30 = vmul.f32 %v1520_v29, %v1145_v24  ;;  %vm1153_vm8 = vweird.f32 %v1520_v29 }
0x14d3   :  { %vm1154_vm10 = vmor %vm1152_vm9, %vm1153_vm8 }
0x14d4   :  { %v1148_v31 = vmul.f32 %v1520_v29, %v1147_v30 }
0x14d6   :  { %v1149_v32 = vmul.f32 0.5, %v1148_v31 }
0x14d8   :  { %v1150_v33 = vsub.f32 1.5, %v1149_v32  ;;  %v1280_v32 = vlaneseq }
0x14da   :  { %v1151_v34 = vmul.f32 %v1520_v29, %v1150_v33  ;;  %v1281_v33 = vand.u32 127, %v1280_v32 }
0x14dc   :  { %v1155_v36 = vsel %vm1154_vm10, %v1520_v29, %v1151_v34  ;;  %v1382_v34 = vld [vmem:[#allocation7 + $0xb] ss:$0 sm:$0xff]  ;;  %vm1282_vm5 = vcmp.lt.s32.totalorder %v1281_v33, 5  ;;  %vm1309_vm8 = vcmp.eq.s32.totalorder %v1281_v33, 5 }
0x14dd   :  { %v1156_v37 = vmul.f32 %v1155_v36, %v1139_v22 }
0x14df   :  { %v1158_v39 = vmul.f32 %v1375_v35, %v1156_v37 }
0x14e1   :  { %v1160_v41 = vadd.f32 %v1376_v38, %v1158_v39 }
0x14e3   :  { %1356 = vmatmul.msk.f32.vlgmr.msra.gmra.mxu3 %vm182_vm2, %v1160_v41 }
0x1566   :  { %v1182_v42 = vpop.f32.mrf.mxu3 }
0x1567   :  { %v1183_v43 = vadd.f32 %v1377_v40, %v1182_v42 }
0x1569   :  { %v1185_v44 = vmax.f32 %v1183_v43, 0.0 }
0x156b   :  { %1214 = vrot.lane.b32.xlu0 %v1185_v44, %s1641_s28  ;;  %v1187_v45 = vsel %vm1186_vm11, %v1185_v44, 0.0 }
0x156c   :  { %1188 = vadd.xlane.f32.xlu2 %v1187_v45 }
0x15dd   :  { %v1215_v46 = vpop.permute.xlu0 %1214 }
0x15de   :  { %v1217_v47 = vsel %vm1186_vm11, %v1215_v46, 0.0 }
0x15df   :  { %1218 = vadd.xlane.f32.xlu0 %v1217_v47  ;;  %v1189_v48 = vpop.xlane.xlu2 %1188 }
0x15e0   :  { %v1190_v49 = vmul.f32 %v1189_v48, %v1675_v10 }
0x15e2   :  { %v1191_v50 = vsub.f32 %v1185_v44, %v1190_v49 }
0x15e4   :  { %v1192_v51 = vmul.f32 %v1191_v50, %v1191_v50 }
0x15e6   :  { %v1193_v52 = vsel %vm1186_vm11, %v1192_v51, 0.0 }
0x15e7   :  { %1194 = vadd.xlane.f32.xlu2 %v1193_v52 }
0x15ff   :  { %1245 = vrot.lane.b32.xlu2 %v1379_v58, %s1642_s29 }
0x1652   :  { %v1219_v53 = vpop.xlane.xlu0 %1218 }
0x1653   :  { %v1220_v54 = vmul.f32 %v1219_v53, %v1675_v10 }
0x1655   :  { %v1221_v55 = vsub.f32 %v1185_v44, %v1220_v54 }
0x1657   :  { %v1222_v56 = vmul.f32 %v1221_v55, %v1221_v55 }
0x1659   :  { %1224 = vrot.lane.b32.xlu1 %v1222_v56, %s1641_s28 }
0x165a   :  { %v1195_v0 = vpop.xlane.xlu2 %1194 }
0x165b   :  { %v1196_v1 = vmul.f32 %v1195_v0, %v1675_v10 }
0x165d   :  { %v1197_v2 = vadd.f32 1e-05, %v1196_v1 }
0x165f   :  { %1521 = vrsqrt.f32 %v1197_v2  ;;  %vm1204_vm13 = vweird.f32 %v1197_v2 }
0x1662   :  { %v1246_v25 = vpop.permute.xlu2 %1245 }
0x1665   :  { %v1522_v4 = vpop.eup %1521 }
0x1666   :  { %v1199_v8 = vmul.f32 %v1522_v4, %v1197_v2  ;;  %vm1205_vm12 = vweird.f32 %v1522_v4 }
0x1667   :  { %vm1206_vm14 = vmor %vm1204_vm13, %vm1205_vm12 }
0x1668   :  { %v1200_v7 = vmul.f32 %v1522_v4, %v1199_v8 }
0x166a   :  { %v1201_v13 = vmul.f32 0.5, %v1200_v7 }
0x166c   :  { %v1202_v15 = vsub.f32 1.5, %v1201_v13 }
0x166e   :  { %v1203_v17 = vmul.f32 %v1522_v4, %v1202_v15 }
0x1670   :  { %v1207_v20 = vsel %vm1206_vm14, %v1522_v4, %v1203_v17 }
0x1671   :  { %v1208_v14 = vmul.f32 %v1207_v20, %v1191_v50 }
0x1673   :  { %v1210_v28 = vmul.f32 %v1380_v23, %v1208_v14 }
0x1675   :  { %v1212_v29 = vadd.f32 %v1381_v26, %v1210_v28 }
0x16cb   :  { %v1225_v59 = vpop.permute.xlu1 %1224 }
0x16cc   :  { %v1227_v60 = vsel %vm1186_vm11, %v1225_v59, 0.0 }
0x16cd   :  { %1228 = vadd.xlane.f32.xlu0 %v1227_v60 }
0x16e1   :  { %1251 = vrot.lane.b32.xlu0 %v1378_v62, %s1642_s29 }
0x1740   :  { %v1229_v5 = vpop.xlane.xlu0 %1228 }
0x1741   :  { %v1230_v11 = vmul.f32 %v1229_v5, %v1675_v10 }
0x1743   :  { %v1231_v12 = vadd.f32 1e-05, %v1230_v11 }
0x1745   :  { %1523 = vrsqrt.f32 %v1231_v12  ;;  %vm1238_vm3 = vweird.f32 %v1231_v12 }
0x174b   :  { %v1524_v16 = vpop.eup %1523 }
0x174c   :  { %v1233_v18 = vmul.f32 %v1524_v16, %v1231_v12  ;;  %vm1239_vm15 = vweird.f32 %v1524_v16 }
0x174d   :  { %vm1240_vm4 = vmor %vm1238_vm3, %vm1239_vm15 }
0x174e   :  { %v1234_v19 = vmul.f32 %v1524_v16, %v1233_v18 }
0x1750   :  { %v1235_v21 = vmul.f32 0.5, %v1234_v19 }
0x1752   :  { %v1236_v22 = vsub.f32 1.5, %v1235_v21 }
0x1753   :  { %v1252_v27 = vpop.permute.xlu0 %1251 }
0x1754   :  { %v1237_v63 = vmul.f32 %v1524_v16, %v1236_v22 }
0x1756   :  { %v1241_v10 = vsel %vm1240_vm4, %v1524_v16, %v1237_v63 }
0x1757   :  { %v1242_v61 = vmul.f32 %v1241_v10, %v1221_v55 }
0x1759   :  { %v1248_v24 = vmul.f32 %v1246_v25, %v1242_v61 }
0x175b   :  { %v1254_v30 = vadd.f32 %v1252_v27, %v1248_v24 }
0x175d   :  { %v1255_v31 = vsel %vm94_vm0, %v1212_v29, %v1254_v30 }
0x175e   :  { %1357 = vmatmul.msk.f32.vlgmr.msra.gmra.mxu0 %vm182_vm2, %v1255_v31 }
0x17db   :  { %v1277_v35 = vpop.f32.mrf.mxu0 }
0x17dc   :  { %v1278_v36 = vadd.f32 %v1382_v34, %v1277_v35 }
0x17de   :  { %v1283_v37 = vsel %vm1282_vm5, %v1278_v36, -1e+30 }
0x17df   :  { %v1285_v38 = vsel %vm1284_vm6, %v1283_v37, -inf }
0x17e0   :  { %1286 = vmax.xlane.f32.xlu1 %v1285_v38 }
0x1853   :  { %v1287_v39 = vpop.xlane.xlu1 %1286 }
0x1854   :  { %v1288_v41 = vsub.f32 %v1283_v37, %v1287_v39 }
0x1856   :  { %v1289_v40 = vmul.f32 1.442695, %v1288_v41 }
0x1858   :  { %1525 = vpow2.f32 %v1289_v40 }
0x185e   :  { %v1526_v42 = vpop.eup %1525 }
0x185f   :  { %v1291_v43 = vsel %vm1284_vm6, %v1526_v42, 0.0 }
0x1860   :  { %1292 = vadd.xlane.f32.xlu2 %v1291_v43 }
0x18d3   :  { %v1293_v44 = vpop.xlane.xlu2 %1292 }
0x18d4   :  { %1527 = vrcp.f32 %v1293_v44  ;;  %v1305_v48 = vand.u32 2147483648, %v1293_v44  ;;  %v1303_v50 = vand.u32 2147483647, %v1293_v44  ;;  %vm1299_vm2 = vweird.f32 %v1293_v44 }
0x18d6   :  { %v1306_v52 = vor.u32 1.1754944e-38, %v1305_v48  ;;  %vm1304_vm1 = vcmp.eq.f32.partialorder %v1303_v50, 8.507059e+37 }
0x18da   :  { %v1528_v45 = vpop.eup %1527 }
0x18db   :  { %v1295_v46 = vmul.f32 %v1528_v45, %v1293_v44  ;;  %vm1300_vm0 = vweird.f32 %v1528_v45 }
0x18dc   :  { %vm1301_vm7 = vmor %vm1299_vm2, %vm1300_vm0 }
0x18dd   :  { %v1296_v47 = vsub.f32 1.0, %v1295_v46 }
0x18df   :  { %v1297_v49 = vmul.f32 %v1528_v45, %v1296_v47 }
0x18e1   :  { %v1298_v51 = vadd.f32 %v1528_v45, %v1297_v49 }
0x18e3   :  { %v1302_v53 = vsel %vm1301_vm7, %v1528_v45, %v1298_v51 }
0x18e4   :  { %v1307_v54 = vsel %vm1304_vm1, %v1306_v52, %v1302_v53 }
0x18e5   :  { %v1308_v55 = vmul.f32 %v1526_v42, %v1307_v54 }
0x18e7   :  { %v1310_v56 = vsel %vm1309_vm8, %v1278_v36, %v1308_v55 }
0x18e8   :  { %1311 = vst [vmem:[#allocation8] sm:$0x3] %v1310_v56 }
0x18e9   :  { %1322 = dma.vmem_to_hbm [thread:$0]  %s1318_s4, 32, %s1320_s7, [#allocation4]  }
0x18ea   :  { %1629 = dma.done.wait [#allocation4], 32  }
0x18eb   :  { %1630 = vsyncadd [#allocation4], 4294967264 }
0x18ec   :  { %1327 = vsyncpa [#allocation3], 1 }
0x18ed   :  { %1328 = vsyncpa [#allocation6], 1 }
0x18ee   :  { %1329 = vsyncpa [#allocation4], 1 }

</bundles_post_ra>
